<compile_context>
chip_gen: v7x
topology: tpu7x:2x2x1
jax: 0.10.0
libtpu: 0.0.40
codegen_flags: <defaults>
</compile_context>

<pallas_src>
from functools import partial

import jax
import jax.numpy as jnp
import numpy as np
from jax import lax
from jax.experimental import pallas as pl
from jax.experimental.pallas import tpu as pltpu


def attention_kernel(x_ref, wqkv_ref, wproj_ref, bproj_ref, o_ref, acc_ref,
                     *, num_heads, n_valid):
    """One grid step = one batch element.

    x_ref     : (1, Np, C)        VMEM bf16
    wqkv_ref  : (3, H, C, hd)     VMEM bf16  (q-part pre-scaled by hd**-0.5)
    wproj_ref : (C, C)            VMEM bf16  (already transposed: y = x @ W)
    bproj_ref : (1, C)            VMEM f32
    o_ref     : (1, Np, C)        VMEM (input dtype)
    acc_ref   : (Np, C)           VMEM f32 scratch (concatenated head outputs)
    """
    x = x_ref[0]                                   # (Np, C) bf16
    n_pad, c = x.shape
    hd = c // num_heads

    for h in range(num_heads):                     # static, small head count
        wq = wqkv_ref[0, h]                        # (C, hd) bf16, scale folded in
        wk = wqkv_ref[1, h]
        wv = wqkv_ref[2, h]

        # Per-head projections: contraction K = C keeps the MXU fed.
        qh = jnp.dot(x, wq, preferred_element_type=jnp.float32)   # (Np, hd) f32
        kh = jnp.dot(x, wk, preferred_element_type=jnp.float32)
        vh = jnp.dot(x, wv, preferred_element_type=jnp.float32)

        # scores = q @ k.T (scale already folded into wq), bf16 in / f32 acc.
        s = lax.dot_general(
            qh.astype(jnp.bfloat16), kh.astype(jnp.bfloat16),
            dimension_numbers=(((1,), (1,)), ((), ())),
            preferred_element_type=jnp.float32)                    # (Np, Np)

        if n_valid < n_pad:                        # static condition (trace time)
            col = lax.broadcasted_iota(jnp.int32, s.shape, 1)
            s = jnp.where(col < n_valid, s, -jnp.inf)

        # Numerically stable softmax; normalize AFTER the PV matmul.
        s = s - jnp.max(s, axis=-1, keepdims=True)
        p = jnp.exp(s)                                             # (Np, Np) f32
        row_sum = jnp.sum(p, axis=-1, keepdims=True)               # (Np, 1)  f32

        pv = jnp.dot(p.astype(jnp.bfloat16), vh.astype(jnp.bfloat16),
                     preferred_element_type=jnp.float32)           # (Np, hd)

        acc_ref[:, h * hd:(h + 1) * hd] = pv * pl.reciprocal(row_sum, approx=True)

    # Output projection (bf16 matmul, f32 accumulate, f32 bias).
    out = acc_ref[...].astype(jnp.bfloat16)                        # (Np, C)
    o = jnp.dot(out, wproj_ref[...], preferred_element_type=jnp.float32)
    o = o + bproj_ref[0]
    o_ref[0] = o.astype(o_ref.dtype)


def attention_forward(x, w_qkv, w_proj, b_proj, *, num_heads):
    """x: (B, N, C). w_qkv: (3C, C), w_proj: (C, C), b_proj: (C,) (nn.Linear layout)."""
    B, N, C = x.shape
    assert C % num_heads == 0, "dim must be divisible by num_heads"
    hd = C // num_heads
    scale = float(hd) ** -0.5
    out_dtype = x.dtype

    # Pad token dim to a multiple of 8 (sublane-friendly); mask in-kernel.
    n_pad = ((N + 7) // 8) * 8
    if n_pad != N:
        x = jnp.pad(x, ((0, 0), (0, n_pad - N), (0, 0)))

    # nn.Linear: y = x @ W.T. Output axis of w_qkv is ordered [3, H, hd].
    w_qkv_t = jnp.transpose(w_qkv)                                  # (C, 3C)
    w_heads = w_qkv_t.reshape(C, 3, num_heads, hd).transpose(1, 2, 0, 3)  # (3,H,C,hd)
    w_heads = w_heads.at[0].multiply(scale)        # fold softmax scale into Q weights
    w_heads = w_heads.astype(jnp.bfloat16)

    w_proj_t = jnp.transpose(w_proj).astype(jnp.bfloat16)           # (C, C)
    b_proj2 = b_proj.reshape(1, C).astype(jnp.float32)              # (1, C)
    x_bf = x.astype(jnp.bfloat16)

    kernel = partial(attention_kernel, num_heads=num_heads, n_valid=N)

    out = pl.pallas_call(
        kernel,
        out_shape=jax.ShapeDtypeStruct((B, n_pad, C), out_dtype),
        grid=(B,),
        in_specs=[
            pl.BlockSpec((1, n_pad, C), lambda b: (b, 0, 0)),
            pl.BlockSpec((3, num_heads, C, hd), lambda b: (0, 0, 0, 0)),
            pl.BlockSpec((C, C), lambda b: (0, 0)),
            pl.BlockSpec((1, C), lambda b: (0, 0)),
        ],
        out_specs=pl.BlockSpec((1, n_pad, C), lambda b: (b, 0, 0)),
        scratch_shapes=[pltpu.VMEM((n_pad, C), jnp.float32)],
        compiler_params=pltpu.CompilerParams(
            dimension_semantics=("parallel",),
            vmem_limit_bytes=32 * 1024 * 1024,
        ),
    )(x_bf, w_heads, w_proj_t, b_proj2)

    return out[:, :N, :]


def reference_attention(x, w_qkv, w_proj, b_proj, num_heads):
    """Pure-JAX f32 reference mirroring the PyTorch forward (eval mode)."""
    B, N, C = x.shape
    hd = C // num_heads
    scale = hd ** -0.5
    qkv = x @ w_qkv.T                                        # (B, N, 3C)
    qkv = qkv.reshape(B, N, 3, num_heads, hd).transpose(2, 0, 3, 1, 4)
    q, k, v = qkv[0], qkv[1], qkv[2]                         # (B, H, N, hd)
    attn = (q @ jnp.swapaxes(k, -2, -1)) * scale
    attn = jax.nn.softmax(attn, axis=-1)
    out = attn @ v                                           # (B, H, N, hd)
    out = out.transpose(0, 2, 1, 3).reshape(B, N, C)
    return out @ w_proj.T + b_proj


if __name__ == "__main__":
    B, N, C = 2, 8, 32
    num_heads = 8

    key = jax.random.PRNGKey(0)
    k_x, k_wqkv, k_wproj, k_bproj = jax.random.split(key, 4)

    x = jax.random.normal(k_x, (B, N, C), dtype=jnp.float32)

    # nn.Linear-shaped parameters, deterministic synthetic init.
    w_qkv = jax.random.normal(k_wqkv, (3 * C, C), dtype=jnp.float32) * (C ** -0.5)
    w_proj = jax.random.normal(k_wproj, (C, C), dtype=jnp.float32) * (C ** -0.5)
    b_proj = jax.random.normal(k_bproj, (C,), dtype=jnp.float32) * 0.02

    out = attention_forward(x, w_qkv, w_proj, b_proj, num_heads=num_heads)
    out = jax.block_until_ready(out)

    ref = reference_attention(x, w_qkv, w_proj, b_proj, num_heads)
    # bf16 matmul inputs with f32 accumulation -> looser tolerance than pure f32.
    np.testing.assert_allclose(np.asarray(out), np.asarray(ref), rtol=5e-2, atol=5e-2)

    print("KERNEL_OK")
</pallas_src>

<mosaic_0001>
module attributes {stable_mosaic.version = 11 : i64} {
  func.func @attention_kernel(%arg0: i32, %arg1: memref<1x8x32xbf16, #tpu.memory_space<vmem>>, %arg2: memref<3x8x32x4xbf16, #tpu.memory_space<vmem>>, %arg3: memref<32x32xbf16, #tpu.memory_space<vmem>>, %arg4: memref<1x32xf32, #tpu.memory_space<vmem>>, %arg5: memref<1x8x32xf32, #tpu.memory_space<vmem>>, %arg6: memref<8x32xf32, #tpu.memory_space<vmem>>) attributes {dimension_semantics = [#tpu.dimension_semantics<parallel>], iteration_bounds = array<i64: 2>, scalar_prefetch = 0 : i64, scratch_operands = 1 : i64, tpu.core_type = #tpu.core_type<tc>, window_params = [{transform_indices = @transform_0, window_bounds = array<i64: 1, 8, 32>}, {pipeline_mode = #tpu.pipeline_mode<synchronous>, transform_indices = @transform_1, window_bounds = array<i64: 3, 8, 32, 4>}, {pipeline_mode = #tpu.pipeline_mode<synchronous>, transform_indices = @transform_2, window_bounds = array<i64: 32, 32>}, {pipeline_mode = #tpu.pipeline_mode<synchronous>, transform_indices = @transform_3, window_bounds = array<i64: 1, 32>}, {transform_indices = @transform_4, window_bounds = array<i64: 1, 8, 32>}]} {
    %c0 = arith.constant 0 : index
    %c0_0 = arith.constant 0 : index
    %c0_1 = arith.constant 0 : index
    %0 = vector.load %arg1[%c0, %c0_0, %c0_1] : memref<1x8x32xbf16, #tpu.memory_space<vmem>>, vector<1x8x32xbf16>
    %1 = vector.shape_cast %0 : vector<1x8x32xbf16> to vector<8x32xbf16>
    %c0_2 = arith.constant 0 : index
    %c0_3 = arith.constant 0 : index
    %c0_4 = arith.constant 0 : index
    %c0_5 = arith.constant 0 : index
    %2 = vector.load %arg2[%c0_2, %c0_3, %c0_4, %c0_5] : memref<3x8x32x4xbf16, #tpu.memory_space<vmem>>, vector<1x1x32x4xbf16>
    %3 = vector.shape_cast %2 : vector<1x1x32x4xbf16> to vector<32x4xbf16>
    %c1 = arith.constant 1 : index
    %c0_6 = arith.constant 0 : index
    %c0_7 = arith.constant 0 : index
    %c0_8 = arith.constant 0 : index
    %4 = vector.load %arg2[%c1, %c0_6, %c0_7, %c0_8] : memref<3x8x32x4xbf16, #tpu.memory_space<vmem>>, vector<1x1x32x4xbf16>
    %5 = vector.shape_cast %4 : vector<1x1x32x4xbf16> to vector<32x4xbf16>
    %c2 = arith.constant 2 : index
    %c0_9 = arith.constant 0 : index
    %c0_10 = arith.constant 0 : index
    %c0_11 = arith.constant 0 : index
    %6 = vector.load %arg2[%c2, %c0_9, %c0_10, %c0_11] : memref<3x8x32x4xbf16, #tpu.memory_space<vmem>>, vector<1x1x32x4xbf16>
    %7 = vector.shape_cast %6 : vector<1x1x32x4xbf16> to vector<32x4xbf16>
    %cst = arith.constant dense<0.000000e+00> : vector<8x4xf32>
    %8 = tpu.matmul %1, %3, %cst {dimension_numbers = #tpu.dot_dimension_numbers<[1], [0], [0], [1], [0, 0, 1, 1], [], []>} : vector<8x32xbf16>, vector<32x4xbf16>, vector<8x4xf32> -> vector<8x4xf32>
    %cst_12 = arith.constant dense<0.000000e+00> : vector<8x4xf32>
    %9 = tpu.matmul %1, %5, %cst_12 {dimension_numbers = #tpu.dot_dimension_numbers<[1], [0], [0], [1], [0, 0, 1, 1], [], []>} : vector<8x32xbf16>, vector<32x4xbf16>, vector<8x4xf32> -> vector<8x4xf32>
    %cst_13 = arith.constant dense<0.000000e+00> : vector<8x4xf32>
    %10 = tpu.matmul %1, %7, %cst_13 {dimension_numbers = #tpu.dot_dimension_numbers<[1], [0], [0], [1], [0, 0, 1, 1], [], []>} : vector<8x32xbf16>, vector<32x4xbf16>, vector<8x4xf32> -> vector<8x4xf32>
    %11 = arith.truncf %8 : vector<8x4xf32> to vector<8x4xbf16>
    %12 = arith.truncf %9 : vector<8x4xf32> to vector<8x4xbf16>
    %cst_14 = arith.constant dense<0.000000e+00> : vector<8x8xf32>
    %13 = tpu.matmul %11, %12, %cst_14 {dimension_numbers = #tpu.dot_dimension_numbers<[1], [1], [0], [0], [0, 0, 1, 0], [], []>} : vector<8x4xbf16>, vector<8x4xbf16>, vector<8x8xf32> -> vector<8x8xf32>
    %cst_15 = arith.constant dense<0xFF800000> : vector<8xf32>
    %14 = vector.multi_reduction <maximumf>, %13, %cst_15 [1] : vector<8x8xf32> to vector<8xf32>
    %15 = vector.shape_cast %14 : vector<8xf32> to vector<8x1xf32>
    %16 = vector.broadcast %15 : vector<8x1xf32> to vector<8x8xf32>
    %17 = arith.subf %13, %16 : vector<8x8xf32>
    %18 = math.exp %17 : vector<8x8xf32>
    %cst_16 = arith.constant dense<0.000000e+00> : vector<8xf32>
    %19 = vector.multi_reduction <add>, %18, %cst_16 [1] : vector<8x8xf32> to vector<8xf32>
    %20 = vector.shape_cast %19 : vector<8xf32> to vector<8x1xf32>
    %21 = arith.truncf %18 : vector<8x8xf32> to vector<8x8xbf16>
    %22 = arith.truncf %10 : vector<8x4xf32> to vector<8x4xbf16>
    %cst_17 = arith.constant dense<0.000000e+00> : vector<8x4xf32>
    %23 = tpu.matmul %21, %22, %cst_17 {dimension_numbers = #tpu.dot_dimension_numbers<[1], [0], [0], [1], [0, 0, 1, 1], [], []>} : vector<8x8xbf16>, vector<8x4xbf16>, vector<8x4xf32> -> vector<8x4xf32>
    %24 = tpu.reciprocal %20 {approx = true} : vector<8x1xf32> -> vector<8x1xf32>
    %25 = vector.broadcast %24 : vector<8x1xf32> to vector<8x4xf32>
    %26 = arith.mulf %23, %25 : vector<8x4xf32>
    %c0_18 = arith.constant 0 : index
    %c0_19 = arith.constant 0 : index
    %27 = vector.load %arg6[%c0_18, %c0_19] : memref<8x32xf32, #tpu.memory_space<vmem>>, vector<8x4xf32>
    tpu.vector_store %arg6[%c0_18, %c0_19], %26 {strides = array<i32>} : memref<8x32xf32, #tpu.memory_space<vmem>>, vector<8x4xf32>,
    %c0_20 = arith.constant 0 : index
    %c1_21 = arith.constant 1 : index
    %c0_22 = arith.constant 0 : index
    %c0_23 = arith.constant 0 : index
    %28 = vector.load %arg2[%c0_20, %c1_21, %c0_22, %c0_23] : memref<3x8x32x4xbf16, #tpu.memory_space<vmem>>, vector<1x1x32x4xbf16>
    %29 = vector.shape_cast %28 : vector<1x1x32x4xbf16> to vector<32x4xbf16>
    %c1_24 = arith.constant 1 : index
    %c1_25 = arith.constant 1 : index
    %c0_26 = arith.constant 0 : index
    %c0_27 = arith.constant 0 : index
    %30 = vector.load %arg2[%c1_24, %c1_25, %c0_26, %c0_27] : memref<3x8x32x4xbf16, #tpu.memory_space<vmem>>, vector<1x1x32x4xbf16>
    %31 = vector.shape_cast %30 : vector<1x1x32x4xbf16> to vector<32x4xbf16>
    %c2_28 = arith.constant 2 : index
    %c1_29 = arith.constant 1 : index
    %c0_30 = arith.constant 0 : index
    %c0_31 = arith.constant 0 : index
    %32 = vector.load %arg2[%c2_28, %c1_29, %c0_30, %c0_31] : memref<3x8x32x4xbf16, #tpu.memory_space<vmem>>, vector<1x1x32x4xbf16>
    %33 = vector.shape_cast %32 : vector<1x1x32x4xbf16> to vector<32x4xbf16>
    %cst_32 = arith.constant dense<0.000000e+00> : vector<8x4xf32>
    %34 = tpu.matmul %1, %29, %cst_32 {dimension_numbers = #tpu.dot_dimension_numbers<[1], [0], [0], [1], [0, 0, 1, 1], [], []>} : vector<8x32xbf16>, vector<32x4xbf16>, vector<8x4xf32> -> vector<8x4xf32>
    %cst_33 = arith.constant dense<0.000000e+00> : vector<8x4xf32>
    %35 = tpu.matmul %1, %31, %cst_33 {dimension_numbers = #tpu.dot_dimension_numbers<[1], [0], [0], [1], [0, 0, 1, 1], [], []>} : vector<8x32xbf16>, vector<32x4xbf16>, vector<8x4xf32> -> vector<8x4xf32>
    %cst_34 = arith.constant dense<0.000000e+00> : vector<8x4xf32>
    %36 = tpu.matmul %1, %33, %cst_34 {dimension_numbers = #tpu.dot_dimension_numbers<[1], [0], [0], [1], [0, 0, 1, 1], [], []>} : vector<8x32xbf16>, vector<32x4xbf16>, vector<8x4xf32> -> vector<8x4xf32>
    %37 = arith.truncf %34 : vector<8x4xf32> to vector<8x4xbf16>
    %38 = arith.truncf %35 : vector<8x4xf32> to vector<8x4xbf16>
    %cst_35 = arith.constant dense<0.000000e+00> : vector<8x8xf32>
    %39 = tpu.matmul %37, %38, %cst_35 {dimension_numbers = #tpu.dot_dimension_numbers<[1], [1], [0], [0], [0, 0, 1, 0], [], []>} : vector<8x4xbf16>, vector<8x4xbf16>, vector<8x8xf32> -> vector<8x8xf32>
    %cst_36 = arith.constant dense<0xFF800000> : vector<8xf32>
    %40 = vector.multi_reduction <maximumf>, %39, %cst_36 [1] : vector<8x8xf32> to vector<8xf32>
    %41 = vector.shape_cast %40 : vector<8xf32> to vector<8x1xf32>
    %42 = vector.broadcast %41 : vector<8x1xf32> to vector<8x8xf32>
    %43 = arith.subf %39, %42 : vector<8x8xf32>
    %44 = math.exp %43 : vector<8x8xf32>
    %cst_37 = arith.constant dense<0.000000e+00> : vector<8xf32>
    %45 = vector.multi_reduction <add>, %44, %cst_37 [1] : vector<8x8xf32> to vector<8xf32>
    %46 = vector.shape_cast %45 : vector<8xf32> to vector<8x1xf32>
    %47 = arith.truncf %44 : vector<8x8xf32> to vector<8x8xbf16>
    %48 = arith.truncf %36 : vector<8x4xf32> to vector<8x4xbf16>
    %cst_38 = arith.constant dense<0.000000e+00> : vector<8x4xf32>
    %49 = tpu.matmul %47, %48, %cst_38 {dimension_numbers = #tpu.dot_dimension_numbers<[1], [0], [0], [1], [0, 0, 1, 1], [], []>} : vector<8x8xbf16>, vector<8x4xbf16>, vector<8x4xf32> -> vector<8x4xf32>
    %50 = tpu.reciprocal %46 {approx = true} : vector<8x1xf32> -> vector<8x1xf32>
    %51 = vector.broadcast %50 : vector<8x1xf32> to vector<8x4xf32>
    %52 = arith.mulf %49, %51 : vector<8x4xf32>
    %c0_39 = arith.constant 0 : index
    %c4 = arith.constant 4 : index
    %53 = vector.load %arg6[%c0_39, %c4] : memref<8x32xf32, #tpu.memory_space<vmem>>, vector<8x4xf32>
    tpu.vector_store %arg6[%c0_39, %c4], %52 {strides = array<i32>} : memref<8x32xf32, #tpu.memory_space<vmem>>, vector<8x4xf32>,
    %c0_40 = arith.constant 0 : index
    %c2_41 = arith.constant 2 : index
    %c0_42 = arith.constant 0 : index
    %c0_43 = arith.constant 0 : index
    %54 = vector.load %arg2[%c0_40, %c2_41, %c0_42, %c0_43] : memref<3x8x32x4xbf16, #tpu.memory_space<vmem>>, vector<1x1x32x4xbf16>
    %55 = vector.shape_cast %54 : vector<1x1x32x4xbf16> to vector<32x4xbf16>
    %c1_44 = arith.constant 1 : index
    %c2_45 = arith.constant 2 : index
    %c0_46 = arith.constant 0 : index
    %c0_47 = arith.constant 0 : index
    %56 = vector.load %arg2[%c1_44, %c2_45, %c0_46, %c0_47] : memref<3x8x32x4xbf16, #tpu.memory_space<vmem>>, vector<1x1x32x4xbf16>
    %57 = vector.shape_cast %56 : vector<1x1x32x4xbf16> to vector<32x4xbf16>
    %c2_48 = arith.constant 2 : index
    %c2_49 = arith.constant 2 : index
    %c0_50 = arith.constant 0 : index
    %c0_51 = arith.constant 0 : index
    %58 = vector.load %arg2[%c2_48, %c2_49, %c0_50, %c0_51] : memref<3x8x32x4xbf16, #tpu.memory_space<vmem>>, vector<1x1x32x4xbf16>
    %59 = vector.shape_cast %58 : vector<1x1x32x4xbf16> to vector<32x4xbf16>
    %cst_52 = arith.constant dense<0.000000e+00> : vector<8x4xf32>
    %60 = tpu.matmul %1, %55, %cst_52 {dimension_numbers = #tpu.dot_dimension_numbers<[1], [0], [0], [1], [0, 0, 1, 1], [], []>} : vector<8x32xbf16>, vector<32x4xbf16>, vector<8x4xf32> -> vector<8x4xf32>
    %cst_53 = arith.constant dense<0.000000e+00> : vector<8x4xf32>
    %61 = tpu.matmul %1, %57, %cst_53 {dimension_numbers = #tpu.dot_dimension_numbers<[1], [0], [0], [1], [0, 0, 1, 1], [], []>} : vector<8x32xbf16>, vector<32x4xbf16>, vector<8x4xf32> -> vector<8x4xf32>
    %cst_54 = arith.constant dense<0.000000e+00> : vector<8x4xf32>
    %62 = tpu.matmul %1, %59, %cst_54 {dimension_numbers = #tpu.dot_dimension_numbers<[1], [0], [0], [1], [0, 0, 1, 1], [], []>} : vector<8x32xbf16>, vector<32x4xbf16>, vector<8x4xf32> -> vector<8x4xf32>
    %63 = arith.truncf %60 : vector<8x4xf32> to vector<8x4xbf16>
    %64 = arith.truncf %61 : vector<8x4xf32> to vector<8x4xbf16>
    %cst_55 = arith.constant dense<0.000000e+00> : vector<8x8xf32>
    %65 = tpu.matmul %63, %64, %cst_55 {dimension_numbers = #tpu.dot_dimension_numbers<[1], [1], [0], [0], [0, 0, 1, 0], [], []>} : vector<8x4xbf16>, vector<8x4xbf16>, vector<8x8xf32> -> vector<8x8xf32>
    %cst_56 = arith.constant dense<0xFF800000> : vector<8xf32>
    %66 = vector.multi_reduction <maximumf>, %65, %cst_56 [1] : vector<8x8xf32> to vector<8xf32>
    %67 = vector.shape_cast %66 : vector<8xf32> to vector<8x1xf32>
    %68 = vector.broadcast %67 : vector<8x1xf32> to vector<8x8xf32>
    %69 = arith.subf %65, %68 : vector<8x8xf32>
    %70 = math.exp %69 : vector<8x8xf32>
    %cst_57 = arith.constant dense<0.000000e+00> : vector<8xf32>
    %71 = vector.multi_reduction <add>, %70, %cst_57 [1] : vector<8x8xf32> to vector<8xf32>
    %72 = vector.shape_cast %71 : vector<8xf32> to vector<8x1xf32>
    %73 = arith.truncf %70 : vector<8x8xf32> to vector<8x8xbf16>
    %74 = arith.truncf %62 : vector<8x4xf32> to vector<8x4xbf16>
    %cst_58 = arith.constant dense<0.000000e+00> : vector<8x4xf32>
    %75 = tpu.matmul %73, %74, %cst_58 {dimension_numbers = #tpu.dot_dimension_numbers<[1], [0], [0], [1], [0, 0, 1, 1], [], []>} : vector<8x8xbf16>, vector<8x4xbf16>, vector<8x4xf32> -> vector<8x4xf32>
    %76 = tpu.reciprocal %72 {approx = true} : vector<8x1xf32> -> vector<8x1xf32>
    %77 = vector.broadcast %76 : vector<8x1xf32> to vector<8x4xf32>
    %78 = arith.mulf %75, %77 : vector<8x4xf32>
    %c0_59 = arith.constant 0 : index
    %c8 = arith.constant 8 : index
    %79 = vector.load %arg6[%c0_59, %c8] : memref<8x32xf32, #tpu.memory_space<vmem>>, vector<8x4xf32>
    tpu.vector_store %arg6[%c0_59, %c8], %78 {strides = array<i32>} : memref<8x32xf32, #tpu.memory_space<vmem>>, vector<8x4xf32>,
    %c0_60 = arith.constant 0 : index
    %c3 = arith.constant 3 : index
    %c0_61 = arith.constant 0 : index
    %c0_62 = arith.constant 0 : index
    %80 = vector.load %arg2[%c0_60, %c3, %c0_61, %c0_62] : memref<3x8x32x4xbf16, #tpu.memory_space<vmem>>, vector<1x1x32x4xbf16>
    %81 = vector.shape_cast %80 : vector<1x1x32x4xbf16> to vector<32x4xbf16>
    %c1_63 = arith.constant 1 : index
    %c3_64 = arith.constant 3 : index
    %c0_65 = arith.constant 0 : index
    %c0_66 = arith.constant 0 : index
    %82 = vector.load %arg2[%c1_63, %c3_64, %c0_65, %c0_66] : memref<3x8x32x4xbf16, #tpu.memory_space<vmem>>, vector<1x1x32x4xbf16>
    %83 = vector.shape_cast %82 : vector<1x1x32x4xbf16> to vector<32x4xbf16>
    %c2_67 = arith.constant 2 : index
    %c3_68 = arith.constant 3 : index
    %c0_69 = arith.constant 0 : index
    %c0_70 = arith.constant 0 : index
    %84 = vector.load %arg2[%c2_67, %c3_68, %c0_69, %c0_70] : memref<3x8x32x4xbf16, #tpu.memory_space<vmem>>, vector<1x1x32x4xbf16>
    %85 = vector.shape_cast %84 : vector<1x1x32x4xbf16> to vector<32x4xbf16>
    %cst_71 = arith.constant dense<0.000000e+00> : vector<8x4xf32>
    %86 = tpu.matmul %1, %81, %cst_71 {dimension_numbers = #tpu.dot_dimension_numbers<[1], [0], [0], [1], [0, 0, 1, 1], [], []>} : vector<8x32xbf16>, vector<32x4xbf16>, vector<8x4xf32> -> vector<8x4xf32>
    %cst_72 = arith.constant dense<0.000000e+00> : vector<8x4xf32>
    %87 = tpu.matmul %1, %83, %cst_72 {dimension_numbers = #tpu.dot_dimension_numbers<[1], [0], [0], [1], [0, 0, 1, 1], [], []>} : vector<8x32xbf16>, vector<32x4xbf16>, vector<8x4xf32> -> vector<8x4xf32>
    %cst_73 = arith.constant dense<0.000000e+00> : vector<8x4xf32>
    %88 = tpu.matmul %1, %85, %cst_73 {dimension_numbers = #tpu.dot_dimension_numbers<[1], [0], [0], [1], [0, 0, 1, 1], [], []>} : vector<8x32xbf16>, vector<32x4xbf16>, vector<8x4xf32> -> vector<8x4xf32>
    %89 = arith.truncf %86 : vector<8x4xf32> to vector<8x4xbf16>
    %90 = arith.truncf %87 : vector<8x4xf32> to vector<8x4xbf16>
    %cst_74 = arith.constant dense<0.000000e+00> : vector<8x8xf32>
    %91 = tpu.matmul %89, %90, %cst_74 {dimension_numbers = #tpu.dot_dimension_numbers<[1], [1], [0], [0], [0, 0, 1, 0], [], []>} : vector<8x4xbf16>, vector<8x4xbf16>, vector<8x8xf32> -> vector<8x8xf32>
    %cst_75 = arith.constant dense<0xFF800000> : vector<8xf32>
    %92 = vector.multi_reduction <maximumf>, %91, %cst_75 [1] : vector<8x8xf32> to vector<8xf32>
    %93 = vector.shape_cast %92 : vector<8xf32> to vector<8x1xf32>
    %94 = vector.broadcast %93 : vector<8x1xf32> to vector<8x8xf32>
    %95 = arith.subf %91, %94 : vector<8x8xf32>
    %96 = math.exp %95 : vector<8x8xf32>
    %cst_76 = arith.constant dense<0.000000e+00> : vector<8xf32>
    %97 = vector.multi_reduction <add>, %96, %cst_76 [1] : vector<8x8xf32> to vector<8xf32>
    %98 = vector.shape_cast %97 : vector<8xf32> to vector<8x1xf32>
    %99 = arith.truncf %96 : vector<8x8xf32> to vector<8x8xbf16>
    %100 = arith.truncf %88 : vector<8x4xf32> to vector<8x4xbf16>
    %cst_77 = arith.constant dense<0.000000e+00> : vector<8x4xf32>
    %101 = tpu.matmul %99, %100, %cst_77 {dimension_numbers = #tpu.dot_dimension_numbers<[1], [0], [0], [1], [0, 0, 1, 1], [], []>} : vector<8x8xbf16>, vector<8x4xbf16>, vector<8x4xf32> -> vector<8x4xf32>
    %102 = tpu.reciprocal %98 {approx = true} : vector<8x1xf32> -> vector<8x1xf32>
    %103 = vector.broadcast %102 : vector<8x1xf32> to vector<8x4xf32>
    %104 = arith.mulf %101, %103 : vector<8x4xf32>
    %c0_78 = arith.constant 0 : index
    %c12 = arith.constant 12 : index
    %105 = vector.load %arg6[%c0_78, %c12] : memref<8x32xf32, #tpu.memory_space<vmem>>, vector<8x4xf32>
    tpu.vector_store %arg6[%c0_78, %c12], %104 {strides = array<i32>} : memref<8x32xf32, #tpu.memory_space<vmem>>, vector<8x4xf32>,
    %c0_79 = arith.constant 0 : index
    %c4_80 = arith.constant 4 : index
    %c0_81 = arith.constant 0 : index
    %c0_82 = arith.constant 0 : index
    %106 = vector.load %arg2[%c0_79, %c4_80, %c0_81, %c0_82] : memref<3x8x32x4xbf16, #tpu.memory_space<vmem>>, vector<1x1x32x4xbf16>
    %107 = vector.shape_cast %106 : vector<1x1x32x4xbf16> to vector<32x4xbf16>
    %c1_83 = arith.constant 1 : index
    %c4_84 = arith.constant 4 : index
    %c0_85 = arith.constant 0 : index
    %c0_86 = arith.constant 0 : index
    %108 = vector.load %arg2[%c1_83, %c4_84, %c0_85, %c0_86] : memref<3x8x32x4xbf16, #tpu.memory_space<vmem>>, vector<1x1x32x4xbf16>
    %109 = vector.shape_cast %108 : vector<1x1x32x4xbf16> to vector<32x4xbf16>
    %c2_87 = arith.constant 2 : index
    %c4_88 = arith.constant 4 : index
    %c0_89 = arith.constant 0 : index
    %c0_90 = arith.constant 0 : index
    %110 = vector.load %arg2[%c2_87, %c4_88, %c0_89, %c0_90] : memref<3x8x32x4xbf16, #tpu.memory_space<vmem>>, vector<1x1x32x4xbf16>
    %111 = vector.shape_cast %110 : vector<1x1x32x4xbf16> to vector<32x4xbf16>
    %cst_91 = arith.constant dense<0.000000e+00> : vector<8x4xf32>
    %112 = tpu.matmul %1, %107, %cst_91 {dimension_numbers = #tpu.dot_dimension_numbers<[1], [0], [0], [1], [0, 0, 1, 1], [], []>} : vector<8x32xbf16>, vector<32x4xbf16>, vector<8x4xf32> -> vector<8x4xf32>
    %cst_92 = arith.constant dense<0.000000e+00> : vector<8x4xf32>
    %113 = tpu.matmul %1, %109, %cst_92 {dimension_numbers = #tpu.dot_dimension_numbers<[1], [0], [0], [1], [0, 0, 1, 1], [], []>} : vector<8x32xbf16>, vector<32x4xbf16>, vector<8x4xf32> -> vector<8x4xf32>
    %cst_93 = arith.constant dense<0.000000e+00> : vector<8x4xf32>
    %114 = tpu.matmul %1, %111, %cst_93 {dimension_numbers = #tpu.dot_dimension_numbers<[1], [0], [0], [1], [0, 0, 1, 1], [], []>} : vector<8x32xbf16>, vector<32x4xbf16>, vector<8x4xf32> -> vector<8x4xf32>
    %115 = arith.truncf %112 : vector<8x4xf32> to vector<8x4xbf16>
    %116 = arith.truncf %113 : vector<8x4xf32> to vector<8x4xbf16>
    %cst_94 = arith.constant dense<0.000000e+00> : vector<8x8xf32>
    %117 = tpu.matmul %115, %116, %cst_94 {dimension_numbers = #tpu.dot_dimension_numbers<[1], [1], [0], [0], [0, 0, 1, 0], [], []>} : vector<8x4xbf16>, vector<8x4xbf16>, vector<8x8xf32> -> vector<8x8xf32>
    %cst_95 = arith.constant dense<0xFF800000> : vector<8xf32>
    %118 = vector.multi_reduction <maximumf>, %117, %cst_95 [1] : vector<8x8xf32> to vector<8xf32>
    %119 = vector.shape_cast %118 : vector<8xf32> to vector<8x1xf32>
    %120 = vector.broadcast %119 : vector<8x1xf32> to vector<8x8xf32>
    %121 = arith.subf %117, %120 : vector<8x8xf32>
    %122 = math.exp %121 : vector<8x8xf32>
    %cst_96 = arith.constant dense<0.000000e+00> : vector<8xf32>
    %123 = vector.multi_reduction <add>, %122, %cst_96 [1] : vector<8x8xf32> to vector<8xf32>
    %124 = vector.shape_cast %123 : vector<8xf32> to vector<8x1xf32>
    %125 = arith.truncf %122 : vector<8x8xf32> to vector<8x8xbf16>
    %126 = arith.truncf %114 : vector<8x4xf32> to vector<8x4xbf16>
    %cst_97 = arith.constant dense<0.000000e+00> : vector<8x4xf32>
    %127 = tpu.matmul %125, %126, %cst_97 {dimension_numbers = #tpu.dot_dimension_numbers<[1], [0], [0], [1], [0, 0, 1, 1], [], []>} : vector<8x8xbf16>, vector<8x4xbf16>, vector<8x4xf32> -> vector<8x4xf32>
    %128 = tpu.reciprocal %124 {approx = true} : vector<8x1xf32> -> vector<8x1xf32>
    %129 = vector.broadcast %128 : vector<8x1xf32> to vector<8x4xf32>
    %130 = arith.mulf %127, %129 : vector<8x4xf32>
    %c0_98 = arith.constant 0 : index
    %c16 = arith.constant 16 : index
    %131 = vector.load %arg6[%c0_98, %c16] : memref<8x32xf32, #tpu.memory_space<vmem>>, vector<8x4xf32>
    tpu.vector_store %arg6[%c0_98, %c16], %130 {strides = array<i32>} : memref<8x32xf32, #tpu.memory_space<vmem>>, vector<8x4xf32>,
    %c0_99 = arith.constant 0 : index
    %c5 = arith.constant 5 : index
    %c0_100 = arith.constant 0 : index
    %c0_101 = arith.constant 0 : index
    %132 = vector.load %arg2[%c0_99, %c5, %c0_100, %c0_101] : memref<3x8x32x4xbf16, #tpu.memory_space<vmem>>, vector<1x1x32x4xbf16>
    %133 = vector.shape_cast %132 : vector<1x1x32x4xbf16> to vector<32x4xbf16>
    %c1_102 = arith.constant 1 : index
    %c5_103 = arith.constant 5 : index
    %c0_104 = arith.constant 0 : index
    %c0_105 = arith.constant 0 : index
    %134 = vector.load %arg2[%c1_102, %c5_103, %c0_104, %c0_105] : memref<3x8x32x4xbf16, #tpu.memory_space<vmem>>, vector<1x1x32x4xbf16>
    %135 = vector.shape_cast %134 : vector<1x1x32x4xbf16> to vector<32x4xbf16>
    %c2_106 = arith.constant 2 : index
    %c5_107 = arith.constant 5 : index
    %c0_108 = arith.constant 0 : index
    %c0_109 = arith.constant 0 : index
    %136 = vector.load %arg2[%c2_106, %c5_107, %c0_108, %c0_109] : memref<3x8x32x4xbf16, #tpu.memory_space<vmem>>, vector<1x1x32x4xbf16>
    %137 = vector.shape_cast %136 : vector<1x1x32x4xbf16> to vector<32x4xbf16>
    %cst_110 = arith.constant dense<0.000000e+00> : vector<8x4xf32>
    %138 = tpu.matmul %1, %133, %cst_110 {dimension_numbers = #tpu.dot_dimension_numbers<[1], [0], [0], [1], [0, 0, 1, 1], [], []>} : vector<8x32xbf16>, vector<32x4xbf16>, vector<8x4xf32> -> vector<8x4xf32>
    %cst_111 = arith.constant dense<0.000000e+00> : vector<8x4xf32>
    %139 = tpu.matmul %1, %135, %cst_111 {dimension_numbers = #tpu.dot_dimension_numbers<[1], [0], [0], [1], [0, 0, 1, 1], [], []>} : vector<8x32xbf16>, vector<32x4xbf16>, vector<8x4xf32> -> vector<8x4xf32>
    %cst_112 = arith.constant dense<0.000000e+00> : vector<8x4xf32>
    %140 = tpu.matmul %1, %137, %cst_112 {dimension_numbers = #tpu.dot_dimension_numbers<[1], [0], [0], [1], [0, 0, 1, 1], [], []>} : vector<8x32xbf16>, vector<32x4xbf16>, vector<8x4xf32> -> vector<8x4xf32>
    %141 = arith.truncf %138 : vector<8x4xf32> to vector<8x4xbf16>
    %142 = arith.truncf %139 : vector<8x4xf32> to vector<8x4xbf16>
    %cst_113 = arith.constant dense<0.000000e+00> : vector<8x8xf32>
    %143 = tpu.matmul %141, %142, %cst_113 {dimension_numbers = #tpu.dot_dimension_numbers<[1], [1], [0], [0], [0, 0, 1, 0], [], []>} : vector<8x4xbf16>, vector<8x4xbf16>, vector<8x8xf32> -> vector<8x8xf32>
    %cst_114 = arith.constant dense<0xFF800000> : vector<8xf32>
    %144 = vector.multi_reduction <maximumf>, %143, %cst_114 [1] : vector<8x8xf32> to vector<8xf32>
    %145 = vector.shape_cast %144 : vector<8xf32> to vector<8x1xf32>
    %146 = vector.broadcast %145 : vector<8x1xf32> to vector<8x8xf32>
    %147 = arith.subf %143, %146 : vector<8x8xf32>
    %148 = math.exp %147 : vector<8x8xf32>
    %cst_115 = arith.constant dense<0.000000e+00> : vector<8xf32>
    %149 = vector.multi_reduction <add>, %148, %cst_115 [1] : vector<8x8xf32> to vector<8xf32>
    %150 = vector.shape_cast %149 : vector<8xf32> to vector<8x1xf32>
    %151 = arith.truncf %148 : vector<8x8xf32> to vector<8x8xbf16>
    %152 = arith.truncf %140 : vector<8x4xf32> to vector<8x4xbf16>
    %cst_116 = arith.constant dense<0.000000e+00> : vector<8x4xf32>
    %153 = tpu.matmul %151, %152, %cst_116 {dimension_numbers = #tpu.dot_dimension_numbers<[1], [0], [0], [1], [0, 0, 1, 1], [], []>} : vector<8x8xbf16>, vector<8x4xbf16>, vector<8x4xf32> -> vector<8x4xf32>
    %154 = tpu.reciprocal %150 {approx = true} : vector<8x1xf32> -> vector<8x1xf32>
    %155 = vector.broadcast %154 : vector<8x1xf32> to vector<8x4xf32>
    %156 = arith.mulf %153, %155 : vector<8x4xf32>
    %c0_117 = arith.constant 0 : index
    %c20 = arith.constant 20 : index
    %157 = vector.load %arg6[%c0_117, %c20] : memref<8x32xf32, #tpu.memory_space<vmem>>, vector<8x4xf32>
    tpu.vector_store %arg6[%c0_117, %c20], %156 {strides = array<i32>} : memref<8x32xf32, #tpu.memory_space<vmem>>, vector<8x4xf32>,
    %c0_118 = arith.constant 0 : index
    %c6 = arith.constant 6 : index
    %c0_119 = arith.constant 0 : index
    %c0_120 = arith.constant 0 : index
    %158 = vector.load %arg2[%c0_118, %c6, %c0_119, %c0_120] : memref<3x8x32x4xbf16, #tpu.memory_space<vmem>>, vector<1x1x32x4xbf16>
    %159 = vector.shape_cast %158 : vector<1x1x32x4xbf16> to vector<32x4xbf16>
    %c1_121 = arith.constant 1 : index
    %c6_122 = arith.constant 6 : index
    %c0_123 = arith.constant 0 : index
    %c0_124 = arith.constant 0 : index
    %160 = vector.load %arg2[%c1_121, %c6_122, %c0_123, %c0_124] : memref<3x8x32x4xbf16, #tpu.memory_space<vmem>>, vector<1x1x32x4xbf16>
    %161 = vector.shape_cast %160 : vector<1x1x32x4xbf16> to vector<32x4xbf16>
    %c2_125 = arith.constant 2 : index
    %c6_126 = arith.constant 6 : index
    %c0_127 = arith.constant 0 : index
    %c0_128 = arith.constant 0 : index
    %162 = vector.load %arg2[%c2_125, %c6_126, %c0_127, %c0_128] : memref<3x8x32x4xbf16, #tpu.memory_space<vmem>>, vector<1x1x32x4xbf16>
    %163 = vector.shape_cast %162 : vector<1x1x32x4xbf16> to vector<32x4xbf16>
    %cst_129 = arith.constant dense<0.000000e+00> : vector<8x4xf32>
    %164 = tpu.matmul %1, %159, %cst_129 {dimension_numbers = #tpu.dot_dimension_numbers<[1], [0], [0], [1], [0, 0, 1, 1], [], []>} : vector<8x32xbf16>, vector<32x4xbf16>, vector<8x4xf32> -> vector<8x4xf32>
    %cst_130 = arith.constant dense<0.000000e+00> : vector<8x4xf32>
    %165 = tpu.matmul %1, %161, %cst_130 {dimension_numbers = #tpu.dot_dimension_numbers<[1], [0], [0], [1], [0, 0, 1, 1], [], []>} : vector<8x32xbf16>, vector<32x4xbf16>, vector<8x4xf32> -> vector<8x4xf32>
    %cst_131 = arith.constant dense<0.000000e+00> : vector<8x4xf32>
    %166 = tpu.matmul %1, %163, %cst_131 {dimension_numbers = #tpu.dot_dimension_numbers<[1], [0], [0], [1], [0, 0, 1, 1], [], []>} : vector<8x32xbf16>, vector<32x4xbf16>, vector<8x4xf32> -> vector<8x4xf32>
    %167 = arith.truncf %164 : vector<8x4xf32> to vector<8x4xbf16>
    %168 = arith.truncf %165 : vector<8x4xf32> to vector<8x4xbf16>
    %cst_132 = arith.constant dense<0.000000e+00> : vector<8x8xf32>
    %169 = tpu.matmul %167, %168, %cst_132 {dimension_numbers = #tpu.dot_dimension_numbers<[1], [1], [0], [0], [0, 0, 1, 0], [], []>} : vector<8x4xbf16>, vector<8x4xbf16>, vector<8x8xf32> -> vector<8x8xf32>
    %cst_133 = arith.constant dense<0xFF800000> : vector<8xf32>
    %170 = vector.multi_reduction <maximumf>, %169, %cst_133 [1] : vector<8x8xf32> to vector<8xf32>
    %171 = vector.shape_cast %170 : vector<8xf32> to vector<8x1xf32>
    %172 = vector.broadcast %171 : vector<8x1xf32> to vector<8x8xf32>
    %173 = arith.subf %169, %172 : vector<8x8xf32>
    %174 = math.exp %173 : vector<8x8xf32>
    %cst_134 = arith.constant dense<0.000000e+00> : vector<8xf32>
    %175 = vector.multi_reduction <add>, %174, %cst_134 [1] : vector<8x8xf32> to vector<8xf32>
    %176 = vector.shape_cast %175 : vector<8xf32> to vector<8x1xf32>
    %177 = arith.truncf %174 : vector<8x8xf32> to vector<8x8xbf16>
    %178 = arith.truncf %166 : vector<8x4xf32> to vector<8x4xbf16>
    %cst_135 = arith.constant dense<0.000000e+00> : vector<8x4xf32>
    %179 = tpu.matmul %177, %178, %cst_135 {dimension_numbers = #tpu.dot_dimension_numbers<[1], [0], [0], [1], [0, 0, 1, 1], [], []>} : vector<8x8xbf16>, vector<8x4xbf16>, vector<8x4xf32> -> vector<8x4xf32>
    %180 = tpu.reciprocal %176 {approx = true} : vector<8x1xf32> -> vector<8x1xf32>
    %181 = vector.broadcast %180 : vector<8x1xf32> to vector<8x4xf32>
    %182 = arith.mulf %179, %181 : vector<8x4xf32>
    %c0_136 = arith.constant 0 : index
    %c24 = arith.constant 24 : index
    %183 = vector.load %arg6[%c0_136, %c24] : memref<8x32xf32, #tpu.memory_space<vmem>>, vector<8x4xf32>
    tpu.vector_store %arg6[%c0_136, %c24], %182 {strides = array<i32>} : memref<8x32xf32, #tpu.memory_space<vmem>>, vector<8x4xf32>,
    %c0_137 = arith.constant 0 : index
    %c7 = arith.constant 7 : index
    %c0_138 = arith.constant 0 : index
    %c0_139 = arith.constant 0 : index
    %184 = vector.load %arg2[%c0_137, %c7, %c0_138, %c0_139] : memref<3x8x32x4xbf16, #tpu.memory_space<vmem>>, vector<1x1x32x4xbf16>
    %185 = vector.shape_cast %184 : vector<1x1x32x4xbf16> to vector<32x4xbf16>
    %c1_140 = arith.constant 1 : index
    %c7_141 = arith.constant 7 : index
    %c0_142 = arith.constant 0 : index
    %c0_143 = arith.constant 0 : index
    %186 = vector.load %arg2[%c1_140, %c7_141, %c0_142, %c0_143] : memref<3x8x32x4xbf16, #tpu.memory_space<vmem>>, vector<1x1x32x4xbf16>
    %187 = vector.shape_cast %186 : vector<1x1x32x4xbf16> to vector<32x4xbf16>
    %c2_144 = arith.constant 2 : index
    %c7_145 = arith.constant 7 : index
    %c0_146 = arith.constant 0 : index
    %c0_147 = arith.constant 0 : index
    %188 = vector.load %arg2[%c2_144, %c7_145, %c0_146, %c0_147] : memref<3x8x32x4xbf16, #tpu.memory_space<vmem>>, vector<1x1x32x4xbf16>
    %189 = vector.shape_cast %188 : vector<1x1x32x4xbf16> to vector<32x4xbf16>
    %cst_148 = arith.constant dense<0.000000e+00> : vector<8x4xf32>
    %190 = tpu.matmul %1, %185, %cst_148 {dimension_numbers = #tpu.dot_dimension_numbers<[1], [0], [0], [1], [0, 0, 1, 1], [], []>} : vector<8x32xbf16>, vector<32x4xbf16>, vector<8x4xf32> -> vector<8x4xf32>
    %cst_149 = arith.constant dense<0.000000e+00> : vector<8x4xf32>
    %191 = tpu.matmul %1, %187, %cst_149 {dimension_numbers = #tpu.dot_dimension_numbers<[1], [0], [0], [1], [0, 0, 1, 1], [], []>} : vector<8x32xbf16>, vector<32x4xbf16>, vector<8x4xf32> -> vector<8x4xf32>
    %cst_150 = arith.constant dense<0.000000e+00> : vector<8x4xf32>
    %192 = tpu.matmul %1, %189, %cst_150 {dimension_numbers = #tpu.dot_dimension_numbers<[1], [0], [0], [1], [0, 0, 1, 1], [], []>} : vector<8x32xbf16>, vector<32x4xbf16>, vector<8x4xf32> -> vector<8x4xf32>
    %193 = arith.truncf %190 : vector<8x4xf32> to vector<8x4xbf16>
    %194 = arith.truncf %191 : vector<8x4xf32> to vector<8x4xbf16>
    %cst_151 = arith.constant dense<0.000000e+00> : vector<8x8xf32>
    %195 = tpu.matmul %193, %194, %cst_151 {dimension_numbers = #tpu.dot_dimension_numbers<[1], [1], [0], [0], [0, 0, 1, 0], [], []>} : vector<8x4xbf16>, vector<8x4xbf16>, vector<8x8xf32> -> vector<8x8xf32>
    %cst_152 = arith.constant dense<0xFF800000> : vector<8xf32>
    %196 = vector.multi_reduction <maximumf>, %195, %cst_152 [1] : vector<8x8xf32> to vector<8xf32>
    %197 = vector.shape_cast %196 : vector<8xf32> to vector<8x1xf32>
    %198 = vector.broadcast %197 : vector<8x1xf32> to vector<8x8xf32>
    %199 = arith.subf %195, %198 : vector<8x8xf32>
    %200 = math.exp %199 : vector<8x8xf32>
    %cst_153 = arith.constant dense<0.000000e+00> : vector<8xf32>
    %201 = vector.multi_reduction <add>, %200, %cst_153 [1] : vector<8x8xf32> to vector<8xf32>
    %202 = vector.shape_cast %201 : vector<8xf32> to vector<8x1xf32>
    %203 = arith.truncf %200 : vector<8x8xf32> to vector<8x8xbf16>
    %204 = arith.truncf %192 : vector<8x4xf32> to vector<8x4xbf16>
    %cst_154 = arith.constant dense<0.000000e+00> : vector<8x4xf32>
    %205 = tpu.matmul %203, %204, %cst_154 {dimension_numbers = #tpu.dot_dimension_numbers<[1], [0], [0], [1], [0, 0, 1, 1], [], []>} : vector<8x8xbf16>, vector<8x4xbf16>, vector<8x4xf32> -> vector<8x4xf32>
    %206 = tpu.reciprocal %202 {approx = true} : vector<8x1xf32> -> vector<8x1xf32>
    %207 = vector.broadcast %206 : vector<8x1xf32> to vector<8x4xf32>
    %208 = arith.mulf %205, %207 : vector<8x4xf32>
    %c0_155 = arith.constant 0 : index
    %c28 = arith.constant 28 : index
    %209 = vector.load %arg6[%c0_155, %c28] : memref<8x32xf32, #tpu.memory_space<vmem>>, vector<8x4xf32>
    tpu.vector_store %arg6[%c0_155, %c28], %208 {strides = array<i32>} : memref<8x32xf32, #tpu.memory_space<vmem>>, vector<8x4xf32>,
    %c0_156 = arith.constant 0 : index
    %c0_157 = arith.constant 0 : index
    %210 = vector.load %arg6[%c0_156, %c0_157] : memref<8x32xf32, #tpu.memory_space<vmem>>, vector<8x32xf32>
    %211 = arith.truncf %210 : vector<8x32xf32> to vector<8x32xbf16>
    %c0_158 = arith.constant 0 : index
    %c0_159 = arith.constant 0 : index
    %212 = vector.load %arg3[%c0_158, %c0_159] : memref<32x32xbf16, #tpu.memory_space<vmem>>, vector<32x32xbf16>
    %cst_160 = arith.constant dense<0.000000e+00> : vector<8x32xf32>
    %213 = tpu.matmul %211, %212, %cst_160 {dimension_numbers = #tpu.dot_dimension_numbers<[1], [0], [0], [1], [0, 0, 1, 1], [], []>} : vector<8x32xbf16>, vector<32x32xbf16>, vector<8x32xf32> -> vector<8x32xf32>
    %c0_161 = arith.constant 0 : index
    %c0_162 = arith.constant 0 : index
    %214 = vector.load %arg4[%c0_161, %c0_162] : memref<1x32xf32, #tpu.memory_space<vmem>>, vector<1x32xf32>
    %215 = vector.shape_cast %214 : vector<1x32xf32> to vector<32xf32>
    %216 = vector.shape_cast %215 : vector<32xf32> to vector<1x32xf32>
    %217 = vector.broadcast %216 : vector<1x32xf32> to vector<8x32xf32>
    %218 = arith.addf %213, %217 : vector<8x32xf32>
    %c0_163 = arith.constant 0 : index
    %c0_164 = arith.constant 0 : index
    %c0_165 = arith.constant 0 : index
    %219 = vector.load %arg5[%c0_163, %c0_164, %c0_165] : memref<1x8x32xf32, #tpu.memory_space<vmem>>, vector<1x8x32xf32>
    %220 = vector.shape_cast %219 : vector<1x8x32xf32> to vector<8x32xf32>
    %221 = vector.shape_cast %218 : vector<8x32xf32> to vector<1x8x32xf32>
    tpu.vector_store %arg5[%c0_163, %c0_164, %c0_165], %221 {strides = array<i32>} : memref<1x8x32xf32, #tpu.memory_space<vmem>>, vector<1x8x32xf32>,
    return
  }
  func.func @transform_0(%arg0: i32) -> (i32, i32, i32) {
    %c0_i32 = arith.constant 0 : i32
    %c0_i32_0 = arith.constant 0 : i32
    %c0_i32_1 = arith.constant 0 : i32
    return %arg0, %c0_i32, %c0_i32_0 : i32, i32, i32
  }
  func.func @transform_1(%arg0: i32) -> (i32, i32, i32, i32) {
    %c0_i32 = arith.constant 0 : i32
    %c0_i32_0 = arith.constant 0 : i32
    %c0_i32_1 = arith.constant 0 : i32
    %c0_i32_2 = arith.constant 0 : i32
    %c0_i32_3 = arith.constant 0 : i32
    return %c0_i32, %c0_i32_0, %c0_i32_1, %c0_i32_2 : i32, i32, i32, i32
  }
  func.func @transform_2(%arg0: i32) -> (i32, i32) {
    %c0_i32 = arith.constant 0 : i32
    %c0_i32_0 = arith.constant 0 : i32
    %c0_i32_1 = arith.constant 0 : i32
    return %c0_i32, %c0_i32_0 : i32, i32
  }
  func.func @transform_3(%arg0: i32) -> (i32, i32) {
    %c0_i32 = arith.constant 0 : i32
    %c0_i32_0 = arith.constant 0 : i32
    %c0_i32_1 = arith.constant 0 : i32
    return %c0_i32, %c0_i32_0 : i32, i32
  }
  func.func @transform_4(%arg0: i32) -> (i32, i32, i32) {
    %c0_i32 = arith.constant 0 : i32
    %c0_i32_0 = arith.constant 0 : i32
    %c0_i32_1 = arith.constant 0 : i32
    return %arg0, %c0_i32, %c0_i32_0 : i32, i32, i32
  }
}

</mosaic_0001>

<bundles_post_ra>
// kernel: tpu_custom_call.1
= control target key start
LH: loop header
LB: loop body
LE: loop exit
PB: predicated region body
PF: predicated region fallthrough
CT: control target
= control target key end

     0   :  { %9 = vsyncpa [#allocation4], 0  ;;  %s3986_s0 = inlined_call_operand.vmem [shape: bf16[2,8,32], index: 0, kind: input, shape index: {}]   ;;  %s3987_s1 = inlined_call_operand.vmem [shape: bf16[3,8,32,4], index: 1, kind: input, shape index: {}]   ;;  %s3988_s2 = inlined_call_operand.vmem [shape: bf16[32,32], index: 2, kind: input, shape index: {}]   ;;  %s3989_s3 = inlined_call_operand.vmem [shape: f32[1,32], index: 3, kind: input, shape index: {}]   ;;  %s3990_s4 = inlined_call_operand.hbm [shape: f32[2,8,32], index: 4, kind: output, shape index: {}]  }
   0x1   :  { %11 = vsyncpa [#allocation4 + $0x1], 0  ;;  %s3437_s15 = smov 0   ;;  %s3439_s16 = smov 0  }
   0x2   :  { %s3441_s17 = smov 0   ;;  %s3443_s18 = smov 0  }
   0x3 LB: > { %s3458_s19 = sadd.s32 4294967295, %s3400_s18   ;;  %s2610_s20 = sadd.s32 4294967294, %s3400_s18   ;;  %s3400_s18 = sphi %s3443_s18, %s3996_s18   ;;  %s3396_s17 = sphi %s3441_s17, %s3995_s17   ;;  %s3392_s16 = sphi %s3439_s16, %s3994_s16   ;;  %s3388_s15 = sphi %s3437_s15, %s3993_s15  }
   0x4   : > { %s3462_s21 = sadd.s32 1, %s3400_s18   ;;  %s113_s22 = sadd.s32 1, %s3396_s17 }
   0x5   : > { %s110_s23 = ssub.s32 %s3400_s18, %s3462_s21  ;;  %p123_p0 = scmp.ne.s32.totalorder %s3396_s17, %s3392_s16 }
   0x6   : > { %p111_p1 = scmp.eq.s32.totalorder %s110_s23, 0  ;;  %p124_p2 = scmp.eq.s32.totalorder %s3458_s19, 1 }
   0x7   : > { %p129_p3 = scmp.ne.s32.totalorder %s3392_s16, %s3388_s15  ;;  %p130_p4 = scmp.eq.s32.totalorder %s2610_s20, 1 }
   0x8   : > { %s3473_s24 = scalar_select %p111_p1, %s3396_s17, %s113_s22  }
   0x9   : > { %p3475_p5 = por %p124_p2, %p123_p0  ;;  %p3479_p6 = por %p130_p4, %p129_p3 }
   0xa   : > { %p2613_p7 = scmp.ge.s32.totalorder %s3400_s18, 1  ;;  %p164_p8 = scmp.lt.s32.totalorder %s3400_s18, 3 }
   0xc   : > { %p165_p9 = pnand %p2613_p7, %p164_p8 }
   0xd   : > { %v3255_v0 = vld [vmem:[%s3987_s1 + $0x80] sm:$0xff] (!%p165_p9)   ;;  %v3402_v1 = vmov (!%p165_p9), 0.0   ;;  %v3256_v2 = vld [vmem:[%s3987_s1 + $0x88] sm:$0xff] (!%p165_p9)   ;;  %vm3403_vm0 = vmmov (!%p165_p9), 0   ;;  %p189_p10 = scmp.lt.s32.totalorder (!%p165_p9), %s3458_s19, 1  ;;  %vm221_vm1 = vcmask (!%p165_p9), 261120  }
   0xe   : > { %168 = sbr.rel (%p165_p9) target bundleno = 5401 (0x1519), region = 36  ;;  %2919 = vmatprep.subr.bf16.mxu1 (!%p165_p9), %v3402_v1  ;;  %2911 = vmatprep.subr.bf16.mxu0 (!%p165_p9), %v3402_v1  ;;  %v3257_v3 = vld [vmem:[%s3987_s1] sm:$0xff] (!%p165_p9)   ;;  %v3258_v4 = vld [vmem:[%s3987_s1 + $0x8] sm:$0xff] (!%p165_p9)   ;;  %vm371_vm2 = vcmask (!%p165_p9), 31744   ;;  %vm418_vm3 = vcmask (!%p165_p9), 64512   ;;  %vm433_vm4 = vcmask (!%p165_p9), 1043456  }
   0xf   : > { %2920 = vmatpush3.bf16.msra.mxu1 (!%p165_p9), %v3255_v0  ;;  %2923 = vmatprep.mubr.msk.bf16.mxu1 (!%p165_p9), %vm3403_vm0, %v3402_v1  ;;  %v3259_v6 = vld [vmem:[%s3987_s1 + $0x100] sm:$0xff] (!%p165_p9)   ;;  %v3260_v7 = vld [vmem:[%s3987_s1 + $0x108] sm:$0xff] (!%p165_p9)   ;;  %v3263_v30 = vld [vmem:[%s3987_s1 + $0x10] sm:$0xff] (!%p165_p9)   ;;  %s3404_s30 = smov (!%p165_p9), 8   ;;  %s3405_s5 = smov (!%p165_p9), 12   ;;  %vm762_vm5 = vcmask (!%p165_p9), 64544  }
  0x10   : > { %2921 = vmatprep.subr.bf16.mxu1 (!%p165_p9), %v3402_v1  ;;  %2915 = vmatprep.mubr.msk.bf16.mxu0 (!%p165_p9), %vm3403_vm0, %v3402_v1  ;;  %v3264_v31 = vld [vmem:[%s3987_s1 + $0x18] sm:$0xff] (!%p165_p9)   ;;  %v3261_v36 = vld [vmem:[%s3987_s1 + $0x90] sm:$0xff] (!%p165_p9)   ;;  %s3406_s6 = smov (!%p165_p9), 16   ;;  %s3408_s8 = smov (!%p165_p9), 4   ;;  %vm1046_vm6 = vcmask (!%p165_p9), 97344   ;;  %vm1330_vm7 = vcmask (!%p165_p9), 130144  }
  0x11   : > { %2912 = vmatpush3.bf16.msra.mxu0 (!%p165_p9), %v3257_v3  ;;  %v3262_v38 = vld [vmem:[%s3987_s1 + $0x98] sm:$0xff] (!%p165_p9)   ;;  %v3265_v43 = vld [vmem:[%s3987_s1 + $0x110] sm:$0xff] (!%p165_p9)   ;;  %s3409_s9 = smov (!%p165_p9), 20   ;;  %vm1614_vm8 = vcmask (!%p165_p9), 162944   ;;  %vm1898_vm9 = vcmask (!%p165_p9), 195744   ;;  %vm2182_vm10 = vcmask (!%p165_p9), 228544  }
  0x12   : > { %2913 = vmatprep.subr.bf16.mxu0 (!%p165_p9), %v3402_v1  ;;  %v3266_v44 = vld [vmem:[%s3987_s1 + $0x118] sm:$0xff] (!%p165_p9)   ;;  %s3410_s20 = smov (!%p165_p9), 28   ;;  %vm2466_vm11 = vcmask (!%p165_p9), 261344   ;;  %s186_s22 = sand.u32 (!%p165_p9), 1, %s3392_s16  }
  0x13   : > { %2922 = vmatpush3.bf16.msra.mxu1 (!%p165_p9), %v3256_v2  ;;  %s2801_s28 = sshll.u32 (!%p165_p9), %s3458_s19, 7 }
  0x14   : > { %2935 = vmatprep.subr.bf16.mxu1 (!%p165_p9), %v3402_v1 }
  0x15   : > { %s190_s7 = scalar_select %p189_p10, %s3458_s19, 1  ;;  %2914 = vmatpush3.bf16.msra.mxu0 %v3258_v4  ;;  %v3269_v4 = vld [vmem:[%s3987_s1 + $0x20] sm:$0xff]  }
  0x16   : > { %2927 = vmatprep.subr.bf16.mxu0 %v3402_v1  ;;  %s2538_s19 = scalar_lea.sflag [#allocation4], %s186_s22 }
  0x17   : > { %s2615_s10 = sshll.u32 %s190_s7, 2  ;;  %s3407_s7 = smov 24  }
  0x18   : > { %s3510_s13 = scalar_lea.vmem %s3986_s0, %s2615_s10 }
  0x19   : > { %v3514_v5 = vld [vmem:[%s3510_s13] sm:$0xf] }
  0x1a   : > { %2924 = vmatmul.mubr.msk.bf16.vlgmr.msra.gmra.mrb[0].mxu1 %vm221_vm1, %v3514_v5  ;;  %2916 = vmatmul.mubr.msk.bf16.vlgmr.msra.gmra.mrb[0].mxu0 %vm221_vm1, %v3514_v5 }
  0x1b   : > { %2937 = vmatprep.mubr.msk.bf16.mxu1 %vm3403_vm0, %v3402_v1  ;;  %2931 = vmatprep.mubr.msk.bf16.mxu0 %vm3403_vm0, %v3402_v1 }
  0x1c   : > { %2928 = vmatpush3.bf16.msra.mxu0 %v3259_v6  ;;  %v3270_v6 = vld [vmem:[%s3987_s1 + $0x28] sm:$0xff]  }
  0x1d   : > { %2929 = vmatprep.subr.bf16.mxu0 %v3402_v1 }
  0x20   : > { %2930 = vmatpush3.bf16.msra.mxu0 %v3260_v7 }
  0x21   : > { %2941 = vmatprep.subr.bf16.mxu0 %v3402_v1 }
  0x23   : > { %2932 = vmatmul.mubr.msk.bf16.vlgmr.msra.gmra.mrb[4].mxu0 %vm221_vm1, %v3514_v5 }
  0x24   : > { %2943 = vmatprep.mubr.msk.bf16.mxu0 %vm3403_vm0, %v3402_v1 }
  0xed   : > { %v311_v8 = vpop.f32.mrb[0].mxu1  ;;  %v259_v12 = vpop.f32.mrb[0].mxu0 }
  0xee   : > { %v370_v9 = vpack.c.bf16 %v311_v8, %v311_v8  ;;  %v2925_v10 = vpop.f32.mrb[1].mxu1  ;;  %v2917_v15 = vpop.f32.mrb[1].mxu0  ;;  %v369_v18 = vpack.c.bf16 %v259_v12, %v259_v12 }
  0xef   : > { %v314_v11 = vpop.f32.mrb[2].mxu1  ;;  %v262_v16 = vpop.f32.mrb[2].mxu0 }
  0xf0   : > { %v376_v13 = vsel %vm371_vm2, %v370_v9, 0  ;;  %v2926_v14 = vpop.f32.mrb[3].mxu1  ;;  %v2918_v17 = vpop.f32.mrb[3].mxu0  ;;  %v3267_v11 = vld [vmem:[%s3987_s1 + $0xa0] sm:$0xff]  }
  0xf1   : > { %2936 = vmatpush3.bf16.xpose.msra.mxu1 %v376_v13  ;;  %v3268_v13 = vld [vmem:[%s3987_s1 + $0xa8] sm:$0xff]  }
  0xf2   : > { %2947 = vmatprep.subr.bf16.mxu1 %v3402_v1 }
  0xf6   : > { %v363_v24 = vpop.f32.mrb[4].mxu0 }
  0xf7   : > { %v429_v25 = vpack.c.bf16 %v363_v24, %v363_v24  ;;  %v2933_v26 = vpop.f32.mrb[5].mxu0 }
  0xf8   : > { %2938 = vmatmul.mubr.msk.bf16.vlgmr.msra.gmra.mrb[4].mxu1 %vm371_vm2, %v369_v18  ;;  %v366_v27 = vpop.f32.mrb[6].mxu0  ;;  %v3271_v18 = vld [vmem:[%s3987_s1 + $0x120] sm:$0xff]  }
  0xf9   : > { %2951 = vmatprep.mubr.msk.bf16.mxu1 %vm3403_vm0, %v3402_v1  ;;  %v435_v28 = vsel %vm433_vm4, %v429_v25, 0  ;;  %v2934_v29 = vpop.f32.mrb[7].mxu0  ;;  %2948 = vmatpush3.bf16.msra.mxu1 %v3263_v30 }
  0xfa   : > { %2942 = vmatpush3.bf16.msra.mxu0 %v435_v28  ;;  %2949 = vmatprep.subr.bf16.mxu1 %v3402_v1 }
  0xfb   : > { %2955 = vmatprep.subr.bf16.mxu0 %v3402_v1 }
  0xfd   : > { %2950 = vmatpush3.bf16.msra.mxu1 %v3264_v31 }
  0xfe   : > { %2963 = vmatprep.subr.bf16.mxu1 %v3402_v1 }
 0x100   : > { %2952 = vmatmul.mubr.msk.bf16.vlgmr.msra.gmra.mrb[8].mxu1 %vm221_vm1, %v3514_v5 }
 0x101   : > { %2967 = vmatprep.mubr.msk.bf16.mxu1 %vm3403_vm0, %v3402_v1  ;;  %2964 = vmatpush3.bf16.msra.mxu1 %v3265_v43  ;;  %v3275_v43 = vld [vmem:[%s3987_s1 + $0x30] sm:$0xff]  }
 0x102   : > { %2965 = vmatprep.subr.bf16.mxu1 %v3402_v1 }
 0x105   : > { %2966 = vmatpush3.bf16.msra.mxu1 %v3266_v44  ;;  %v3276_v44 = vld [vmem:[%s3987_s1 + $0x38] sm:$0xff]  }
 0x106   : > { %2977 = vmatprep.subr.bf16.mxu1 %v3402_v1 }
 0x108   : > { %2968 = vmatmul.mubr.msk.bf16.vlgmr.msra.gmra.mrb[12].mxu1 %vm221_vm1, %v3514_v5 }
 0x109   : > { %2979 = vmatprep.mubr.msk.bf16.mxu1 %vm3403_vm0, %v3402_v1 }
 0x1cb   : > { %v412_v19 = vpop.f32.mrb[4].mxu1 }
 0x1cc   : > { %v2939_v20 = vpop.f32.mrb[5].mxu1  ;;  %v419_v21 = vsel %vm418_vm3, %v412_v19, -inf }
 0x1cd   : > { %420 = vmax.xlane.f32.xlu0 %v419_v21  ;;  %v415_v22 = vpop.f32.mrb[6].mxu1 }
 0x1ce   : > { %v2940_v23 = vpop.f32.mrb[7].mxu1 }
 0x1d3   : > { %v541_v39 = vpop.f32.mrb[8].mxu1 }
 0x1d4   : > { %v2953_v40 = vpop.f32.mrb[9].mxu1  ;;  %v651_v55 = vpack.c.bf16 %v541_v39, %v541_v39 }
 0x1d5   : > { %v544_v41 = vpop.f32.mrb[10].mxu1 }
 0x1d6   : > { %v2954_v42 = vpop.f32.mrb[11].mxu1 }
 0x1db   : > { %v645_v61 = vpop.f32.mrb[12].mxu1 }
 0x1dc   : > { %v709_v62 = vpack.c.bf16 %v645_v61, %v645_v61  ;;  %v2969_v63 = vpop.f32.mrb[13].mxu1 }
 0x1dd   : > { %v648_v0 = vpop.f32.mrb[14].mxu1 }
 0x1de   : > { %v714_v2 = vsel %vm433_vm4, %v709_v62, 0  ;;  %v2970_v3 = vpop.f32.mrb[15].mxu1 }
 0x1df   : > { %2978 = vmatpush3.bf16.msra.mxu1 %v714_v2 }
 0x1e0   : > { %2991 = vmatprep.subr.bf16.mxu1 %v3402_v1 }
 0x25a   : > { %v421_v32 = vpop.xlane.xlu0 %420 }
 0x25b   : > { %v422_v33 = vsub.f32 %v412_v19, %v421_v32  ;;  %v3272_v19 = vld [vmem:[%s3987_s1 + $0x128] sm:$0xff]  }
 0x25d   : > { %v423_v34 = vmul.f32 1.442695, %v422_v33 }
 0x25f   : > { %3305 = vpow2.f32 %v423_v34 }
 0x269   : > { %v3557_v35 = vpop.eup %3305 }
 0x26a   : > { %v428_v37 = vpack.c.bf16 %v3557_v35, %v3557_v35 }
 0x26c   : > { %2944 = vmatmul.mubr.msk.bf16.vlgmr.msra.gmra.mrb[8].mxu0 %vm418_vm3, %v428_v37 }
 0x26d   : > { %2956 = vmatpush3.bf16.msra.mxu0 %v3261_v36  ;;  %2959 = vmatprep.mubr.msk.bf16.mxu0 %vm3403_vm0, %v3402_v1 }
 0x26e   : > { %2957 = vmatprep.subr.bf16.mxu0 %v3402_v1 }
 0x271   : > { %2958 = vmatpush3.bf16.msra.mxu0 %v3262_v38 }
 0x272   : > { %2971 = vmatprep.subr.bf16.mxu0 %v3402_v1 }
 0x274   : > { %2960 = vmatmul.mubr.msk.bf16.vlgmr.msra.gmra.mrb[12].mxu0 %vm221_vm1, %v3514_v5 }
 0x275   : > { %2973 = vmatprep.mubr.msk.bf16.mxu0 %vm3403_vm0, %v3402_v1 }
 0x33f   : > { %v3588_v45 = vpop.f32.mrb[8].mxu0 }
 0x340   : > { %v2945_v46 = vpop.f32.mrb[9].mxu0 }
 0x341   : > { %v474_v47 = vpop.f32.mrb[10].mxu0 }
 0x342   : > { %v2946_v48 = vpop.f32.mrb[11].mxu0 }
 0x347   : > { %v593_v49 = vpop.f32.mrb[12].mxu0 }
 0x348   : > { %v652_v50 = vpack.c.bf16 %v593_v49, %v593_v49  ;;  %v2961_v51 = vpop.f32.mrb[13].mxu0 }
 0x349   : > { %v596_v52 = vpop.f32.mrb[14].mxu0 }
 0x34a   : > { %v657_v53 = vsel %vm371_vm2, %v652_v50, 0  ;;  %v2962_v54 = vpop.f32.mrb[15].mxu0  ;;  %v3273_v50 = vld [vmem:[%s3987_s1 + $0xb0] sm:$0xff]   ;;  %v3274_v52 = vld [vmem:[%s3987_s1 + $0xb8] sm:$0xff]  }
 0x34b   : > { %2972 = vmatpush3.bf16.xpose.msra.mxu0 %v657_v53 }
 0x34c   : > { %2983 = vmatprep.subr.bf16.mxu0 %v3402_v1 }
 0x352   : > { %2974 = vmatmul.mubr.msk.bf16.vlgmr.msra.gmra.mrb[16].mxu0 %vm371_vm2, %v651_v55 }
 0x353   : > { %2987 = vmatprep.mubr.msk.bf16.mxu0 %vm3403_vm0, %v3402_v1  ;;  %2984 = vmatpush3.bf16.msra.mxu0 %v3269_v4 }
 0x354   : > { %2985 = vmatprep.subr.bf16.mxu0 %v3402_v1 }
 0x357   : > { %2986 = vmatpush3.bf16.msra.mxu0 %v3270_v6 }
 0x358   : > { %2999 = vmatprep.subr.bf16.mxu0 %v3402_v1 }
 0x35a   : > { %2988 = vmatmul.mubr.msk.bf16.vlgmr.msra.gmra.mrb[20].mxu0 %vm221_vm1, %v3514_v5 }
 0x35b   : > { %3003 = vmatprep.mubr.msk.bf16.mxu0 %vm3403_vm0, %v3402_v1  ;;  %3000 = vmatpush3.bf16.msra.mxu0 %v3271_v18 }
 0x35c   : > { %3001 = vmatprep.subr.bf16.mxu0 %v3402_v1 }
 0x35f   : > { %3002 = vmatpush3.bf16.msra.mxu0 %v3272_v19 }
 0x360   : > { %3013 = vmatprep.subr.bf16.mxu0 %v3402_v1 }
 0x362   : > { %3004 = vmatmul.mubr.msk.bf16.vlgmr.msra.gmra.mrb[24].mxu0 %vm221_vm1, %v3514_v5 }
 0x363   : > { %3015 = vmatprep.mubr.msk.bf16.mxu0 %vm3403_vm0, %v3402_v1 }
 0x425   : > { %v693_v56 = vpop.f32.mrb[16].mxu0 }
 0x426   : > { %v2975_v57 = vpop.f32.mrb[17].mxu0  ;;  %v699_v58 = vsel %vm418_vm3, %v693_v56, -inf }
 0x427   : > { %700 = vmax.xlane.f32.xlu0 %v699_v58  ;;  %v696_v59 = vpop.f32.mrb[18].mxu0  ;;  %v3277_v57 = vld [vmem:[%s3987_s1 + $0x130] sm:$0xff]   ;;  %v3278_v58 = vld [vmem:[%s3987_s1 + $0x138] sm:$0xff]  }
 0x428   : > { %v2976_v60 = vpop.f32.mrb[19].mxu0 }
 0x42d   : > { %v825_v14 = vpop.f32.mrb[20].mxu0 }
 0x42e   : > { %v2989_v15 = vpop.f32.mrb[21].mxu0  ;;  %v935_v30 = vpack.c.bf16 %v825_v14, %v825_v14 }
 0x42f   : > { %v828_v16 = vpop.f32.mrb[22].mxu0 }
 0x430   : > { %v2990_v17 = vpop.f32.mrb[23].mxu0 }
 0x435   : > { %v929_v37 = vpop.f32.mrb[24].mxu0 }
 0x436   : > { %v993_v38 = vpack.c.bf16 %v929_v37, %v929_v37  ;;  %v3005_v39 = vpop.f32.mrb[25].mxu0 }
 0x437   : > { %v932_v40 = vpop.f32.mrb[26].mxu0 }
 0x438   : > { %v998_v41 = vsel %vm433_vm4, %v993_v38, 0  ;;  %v3006_v42 = vpop.f32.mrb[27].mxu0 }
 0x439   : > { %3014 = vmatpush3.bf16.msra.mxu0 %v998_v41 }
 0x43a   : > { %3027 = vmatprep.subr.bf16.mxu0 %v3402_v1 }
 0x4b4   : > { %v701_v7 = vpop.xlane.xlu0 %700 }
 0x4b5   : > { %v702_v8 = vsub.f32 %v693_v56, %v701_v7 }
 0x4b7   : > { %v703_v9 = vmul.f32 1.442695, %v702_v8 }
 0x4b9   : > { %3307 = vpow2.f32 %v703_v9 }
 0x4c3   : > { %v3610_v10 = vpop.eup %3307 }
 0x4c4   : > { %v708_v12 = vpack.c.bf16 %v3610_v10, %v3610_v10 }
 0x4c6   : > { %2980 = vmatmul.mubr.msk.bf16.vlgmr.msra.gmra.mrb[16].mxu1 %vm418_vm3, %v708_v12 }
 0x4c7   : > { %2992 = vmatpush3.bf16.msra.mxu1 %v3267_v11  ;;  %2995 = vmatprep.mubr.msk.bf16.mxu1 %vm3403_vm0, %v3402_v1 }
 0x4c8   : > { %2993 = vmatprep.subr.bf16.mxu1 %v3402_v1 }
 0x4cb   : > { %2994 = vmatpush3.bf16.msra.mxu1 %v3268_v13 }
 0x4cc   : > { %3007 = vmatprep.subr.bf16.mxu1 %v3402_v1 }
 0x4ce   : > { %2996 = vmatmul.mubr.msk.bf16.vlgmr.msra.gmra.mrb[20].mxu1 %vm221_vm1, %v3514_v5 }
 0x4cf   : > { %3009 = vmatprep.mubr.msk.bf16.mxu1 %vm3403_vm0, %v3402_v1 }
 0x599   : > { %v3641_v20 = vpop.f32.mrb[16].mxu1 }
 0x59a   : > { %v2981_v21 = vpop.f32.mrb[17].mxu1 }
 0x59b   : > { %v753_v22 = vpop.f32.mrb[18].mxu1  ;;  %v3281_v21 = vld [vmem:[%s3987_s1 + $0x40] sm:$0xff]  }
 0x59c   : > { %v2982_v23 = vpop.f32.mrb[19].mxu1  ;;  %v3282_v22 = vld [vmem:[%s3987_s1 + $0x48] sm:$0xff]  }
 0x5a1   : > { %v877_v24 = vpop.f32.mrb[20].mxu1 }
 0x5a2   : > { %v936_v25 = vpack.c.bf16 %v877_v24, %v877_v24  ;;  %v2997_v26 = vpop.f32.mrb[21].mxu1 }
 0x5a3   : > { %v880_v27 = vpop.f32.mrb[22].mxu1 }
 0x5a4   : > { %v941_v28 = vsel %vm371_vm2, %v936_v25, 0  ;;  %v2998_v29 = vpop.f32.mrb[23].mxu1  ;;  %v3279_v27 = vld [vmem:[%s3987_s1 + $0xc0] sm:$0xff]  }
 0x5a5   : > { %3008 = vmatpush3.bf16.xpose.msra.mxu1 %v941_v28  ;;  %v3280_v29 = vld [vmem:[%s3987_s1 + $0xc8] sm:$0xff]  }
 0x5a6   : > { %3019 = vmatprep.subr.bf16.mxu1 %v3402_v1 }
 0x5ac   : > { %3010 = vmatmul.mubr.msk.bf16.vlgmr.msra.gmra.mrb[24].mxu1 %vm371_vm2, %v935_v30 }
 0x5ad   : > { %3023 = vmatprep.mubr.msk.bf16.mxu1 %vm3403_vm0, %v3402_v1  ;;  %3020 = vmatpush3.bf16.msra.mxu1 %v3275_v43 }
 0x5ae   : > { %3021 = vmatprep.subr.bf16.mxu1 %v3402_v1 }
 0x5b1   : > { %3022 = vmatpush3.bf16.msra.mxu1 %v3276_v44 }
 0x5b2   : > { %3035 = vmatprep.subr.bf16.mxu1 %v3402_v1 }
 0x5b4   : > { %3024 = vmatmul.mubr.msk.bf16.vlgmr.msra.gmra.mrb[28].mxu1 %vm221_vm1, %v3514_v5 }
 0x5b5   : > { %3039 = vmatprep.mubr.msk.bf16.mxu1 %vm3403_vm0, %v3402_v1  ;;  %3036 = vmatpush3.bf16.msra.mxu1 %v3277_v57 }
 0x5b6   : > { %3037 = vmatprep.subr.bf16.mxu1 %v3402_v1 }
 0x5b9   : > { %3038 = vmatpush3.bf16.msra.mxu1 %v3278_v58 }
 0x5ba   : > { %3049 = vmatprep.subr.bf16.mxu1 %v3402_v1 }
 0x5bc   : > { %3040 = vmatmul.mubr.msk.bf16.vlgmr.msra.gmra.mrb[32].mxu1 %vm221_vm1, %v3514_v5 }
 0x5bd   : > { %3051 = vmatprep.mubr.msk.bf16.mxu1 %vm3403_vm0, %v3402_v1 }
 0x67f   : > { %v977_v31 = vpop.f32.mrb[24].mxu1 }
 0x680   : > { %v3011_v32 = vpop.f32.mrb[25].mxu1  ;;  %v983_v33 = vsel %vm418_vm3, %v977_v31, -inf }
 0x681   : > { %984 = vmax.xlane.f32.xlu1 %v983_v33  ;;  %v980_v34 = vpop.f32.mrb[26].mxu1 }
 0x682   : > { %v3012_v36 = vpop.f32.mrb[27].mxu1  ;;  %v3283_v34 = vld [vmem:[%s3987_s1 + $0x140] sm:$0xff]  }
 0x683   : > { %v3284_v36 = vld [vmem:[%s3987_s1 + $0x148] sm:$0xff]  }
 0x687   : > { %v1109_v53 = vpop.f32.mrb[28].mxu1 }
 0x688   : > { %v3025_v54 = vpop.f32.mrb[29].mxu1  ;;  %v1219_v7 = vpack.c.bf16 %v1109_v53, %v1109_v53 }
 0x689   : > { %v1112_v55 = vpop.f32.mrb[30].mxu1 }
 0x68a   : > { %v3026_v56 = vpop.f32.mrb[31].mxu1 }
 0x68f   : > { %v1213_v14 = vpop.f32.mrb[32].mxu1 }
 0x690   : > { %v1277_v15 = vpack.c.bf16 %v1213_v14, %v1213_v14  ;;  %v3041_v16 = vpop.f32.mrb[33].mxu1  ;;  %v3289_v14 = vld [vmem:[%s3987_s1 + $0x150] sm:$0xff]  }
 0x691   : > { %v1216_v17 = vpop.f32.mrb[34].mxu1 }
 0x692   : > { %v1282_v18 = vsel %vm433_vm4, %v1277_v15, 0  ;;  %v3042_v19 = vpop.f32.mrb[35].mxu1  ;;  %v3290_v15 = vld [vmem:[%s3987_s1 + $0x158] sm:$0xff]  }
 0x693   : > { %3050 = vmatpush3.bf16.msra.mxu1 %v1282_v18 }
 0x694   : > { %3063 = vmatprep.subr.bf16.mxu1 %v3402_v1 }
 0x70e   : > { %v985_v46 = vpop.xlane.xlu1 %984 }
 0x70f   : > { %v986_v47 = vsub.f32 %v977_v31, %v985_v46 }
 0x711   : > { %v987_v48 = vmul.f32 1.442695, %v986_v47 }
 0x713   : > { %3309 = vpow2.f32 %v987_v48 }
 0x71d   : > { %v3663_v49 = vpop.eup %3309 }
 0x71e   : > { %v992_v51 = vpack.c.bf16 %v3663_v49, %v3663_v49 }
 0x720   : > { %3016 = vmatmul.mubr.msk.bf16.vlgmr.msra.gmra.mrb[28].mxu0 %vm418_vm3, %v992_v51 }
 0x721   : > { %3028 = vmatpush3.bf16.msra.mxu0 %v3273_v50  ;;  %3031 = vmatprep.mubr.msk.bf16.mxu0 %vm3403_vm0, %v3402_v1 }
 0x722   : > { %3029 = vmatprep.subr.bf16.mxu0 %v3402_v1 }
 0x725   : > { %3030 = vmatpush3.bf16.msra.mxu0 %v3274_v52 }
 0x726   : > { %3043 = vmatprep.subr.bf16.mxu0 %v3402_v1 }
 0x728   : > { %3032 = vmatmul.mubr.msk.bf16.vlgmr.msra.gmra.mrb[32].mxu0 %vm221_vm1, %v3514_v5 }
 0x729   : > { %3045 = vmatprep.mubr.msk.bf16.mxu0 %vm3403_vm0, %v3402_v1 }
 0x7f3   : > { %v3694_v59 = vpop.f32.mrb[28].mxu0 }
 0x7f4   : > { %v3017_v60 = vpop.f32.mrb[29].mxu0 }
 0x7f5   : > { %v1037_v61 = vpop.f32.mrb[30].mxu0 }
 0x7f6   : > { %v3018_v62 = vpop.f32.mrb[31].mxu0 }
 0x7f7   : > { %v3287_v62 = vld [vmem:[%s3987_s1 + $0x50] sm:$0xff]  }
 0x7fb   : > { %v1161_v63 = vpop.f32.mrb[32].mxu0 }
 0x7fc   : > { %v1220_v0 = vpack.c.bf16 %v1161_v63, %v1161_v63  ;;  %v3033_v2 = vpop.f32.mrb[33].mxu0  ;;  %v3288_v63 = vld [vmem:[%s3987_s1 + $0x58] sm:$0xff]  }
 0x7fd   : > { %v1164_v3 = vpop.f32.mrb[34].mxu0 }
 0x7fe   : > { %v1225_v4 = vsel %vm371_vm2, %v1220_v0, 0  ;;  %v3034_v6 = vpop.f32.mrb[35].mxu0 }
 0x7ff   : > { %3044 = vmatpush3.bf16.xpose.msra.mxu0 %v1225_v4  ;;  %v3285_v6 = vld [vmem:[%s3987_s1 + $0xd0] sm:$0xff]  }
 0x800   : > { %3055 = vmatprep.subr.bf16.mxu0 %v3402_v1 }
 0x806   : > { %3046 = vmatmul.mubr.msk.bf16.vlgmr.msra.gmra.mrb[36].mxu0 %vm371_vm2, %v1219_v7 }
 0x807   : > { %3059 = vmatprep.mubr.msk.bf16.mxu0 %vm3403_vm0, %v3402_v1  ;;  %3056 = vmatpush3.bf16.msra.mxu0 %v3281_v21 }
 0x808   : > { %3057 = vmatprep.subr.bf16.mxu0 %v3402_v1 }
 0x80b   : > { %3058 = vmatpush3.bf16.msra.mxu0 %v3282_v22 }
 0x80c   : > { %3071 = vmatprep.subr.bf16.mxu0 %v3402_v1 }
 0x80e   : > { %3060 = vmatmul.mubr.msk.bf16.vlgmr.msra.gmra.mrb[40].mxu0 %vm221_vm1, %v3514_v5 }
 0x80f   : > { %3075 = vmatprep.mubr.msk.bf16.mxu0 %vm3403_vm0, %v3402_v1  ;;  %3072 = vmatpush3.bf16.msra.mxu0 %v3283_v34 }
 0x810   : > { %3073 = vmatprep.subr.bf16.mxu0 %v3402_v1 }
 0x813   : > { %3074 = vmatpush3.bf16.msra.mxu0 %v3284_v36 }
 0x814   : > { %3085 = vmatprep.subr.bf16.mxu0 %v3402_v1 }
 0x816   : > { %3076 = vmatmul.mubr.msk.bf16.vlgmr.msra.gmra.mrb[44].mxu0 %vm221_vm1, %v3514_v5 }
 0x817   : > { %3087 = vmatprep.mubr.msk.bf16.mxu0 %vm3403_vm0, %v3402_v1 }
 0x8d9   : > { %v1261_v8 = vpop.f32.mrb[36].mxu0 }
 0x8da   : > { %v3047_v9 = vpop.f32.mrb[37].mxu0  ;;  %v1267_v11 = vsel %vm418_vm3, %v1261_v8, -inf }
 0x8db   : > { %1268 = vmax.xlane.f32.xlu1 %v1267_v11  ;;  %v1264_v12 = vpop.f32.mrb[38].mxu0 }
 0x8dc   : > { %v3048_v13 = vpop.f32.mrb[39].mxu0 }
 0x8e1   : > { %v1393_v30 = vpop.f32.mrb[40].mxu0 }
 0x8e2   : > { %v3061_v31 = vpop.f32.mrb[41].mxu0  ;;  %v1503_v48 = vpack.c.bf16 %v1393_v30, %v1393_v30 }
 0x8e3   : > { %v1396_v32 = vpop.f32.mrb[42].mxu0 }
 0x8e4   : > { %v3062_v33 = vpop.f32.mrb[43].mxu0 }
 0x8e9   : > { %v1497_v55 = vpop.f32.mrb[44].mxu0 }
 0x8ea   : > { %v1561_v56 = vpack.c.bf16 %v1497_v55, %v1497_v55  ;;  %v3077_v57 = vpop.f32.mrb[45].mxu0 }
 0x8eb   : > { %v1500_v58 = vpop.f32.mrb[46].mxu0  ;;  %v3295_v57 = vld [vmem:[%s3987_s1 + $0x160] sm:$0xff]  }
 0x8ec   : > { %v1566_v60 = vsel %vm433_vm4, %v1561_v56, 0  ;;  %v3078_v61 = vpop.f32.mrb[47].mxu0  ;;  %v3296_v58 = vld [vmem:[%s3987_s1 + $0x168] sm:$0xff]  }
 0x8ed   : > { %3086 = vmatpush3.bf16.msra.mxu0 %v1566_v60 }
 0x8ee   : > { %3099 = vmatprep.subr.bf16.mxu0 %v3402_v1 }
 0x968   : > { %v1269_v23 = vpop.xlane.xlu1 %1268 }
 0x969   : > { %v1270_v24 = vsub.f32 %v1261_v8, %v1269_v23  ;;  %v3286_v8 = vld [vmem:[%s3987_s1 + $0xd8] sm:$0xff]  }
 0x96b   : > { %v1271_v25 = vmul.f32 1.442695, %v1270_v24 }
 0x96d   : > { %3311 = vpow2.f32 %v1271_v25 }
 0x977   : > { %v3716_v26 = vpop.eup %3311 }
 0x978   : > { %v1276_v28 = vpack.c.bf16 %v3716_v26, %v3716_v26 }
 0x97a   : > { %3052 = vmatmul.mubr.msk.bf16.vlgmr.msra.gmra.mrb[36].mxu1 %vm418_vm3, %v1276_v28 }
 0x97b   : > { %3064 = vmatpush3.bf16.msra.mxu1 %v3279_v27  ;;  %3067 = vmatprep.mubr.msk.bf16.mxu1 %vm3403_vm0, %v3402_v1 }
 0x97c   : > { %3065 = vmatprep.subr.bf16.mxu1 %v3402_v1 }
 0x97f   : > { %3066 = vmatpush3.bf16.msra.mxu1 %v3280_v29 }
 0x980   : > { %3079 = vmatprep.subr.bf16.mxu1 %v3402_v1 }
 0x982   : > { %3068 = vmatmul.mubr.msk.bf16.vlgmr.msra.gmra.mrb[40].mxu1 %vm221_vm1, %v3514_v5 }
 0x983   : > { %3081 = vmatprep.mubr.msk.bf16.mxu1 %vm3403_vm0, %v3402_v1 }
 0xa4d   : > { %v3747_v37 = vpop.f32.mrb[36].mxu1 }
 0xa4e   : > { %v3053_v38 = vpop.f32.mrb[37].mxu1 }
 0xa4f   : > { %v1321_v39 = vpop.f32.mrb[38].mxu1 }
 0xa50   : > { %v3054_v40 = vpop.f32.mrb[39].mxu1 }
 0xa55   : > { %v1445_v41 = vpop.f32.mrb[40].mxu1 }
 0xa56   : > { %v1504_v42 = vpack.c.bf16 %v1445_v41, %v1445_v41  ;;  %v3069_v43 = vpop.f32.mrb[41].mxu1 }
 0xa57   : > { %v1448_v44 = vpop.f32.mrb[42].mxu1  ;;  %v3294_v43 = vld [vmem:[%s3987_s1 + $0x68] sm:$0xff]  }
 0xa58   : > { %v1509_v46 = vsel %vm371_vm2, %v1504_v42, 0  ;;  %v3070_v47 = vpop.f32.mrb[43].mxu1  ;;  %v3293_v42 = vld [vmem:[%s3987_s1 + $0x60] sm:$0xff]  }
 0xa59   : > { %3080 = vmatpush3.bf16.xpose.msra.mxu1 %v1509_v46 }
 0xa5a   : > { %3091 = vmatprep.subr.bf16.mxu1 %v3402_v1 }
 0xa60   : > { %3082 = vmatmul.mubr.msk.bf16.vlgmr.msra.gmra.mrb[44].mxu1 %vm371_vm2, %v1503_v48 }
 0xa61   : > { %3095 = vmatprep.mubr.msk.bf16.mxu1 %vm3403_vm0, %v3402_v1  ;;  %3092 = vmatpush3.bf16.msra.mxu1 %v3287_v62 }
 0xa62   : > { %3093 = vmatprep.subr.bf16.mxu1 %v3402_v1 }
 0xa65   : > { %3094 = vmatpush3.bf16.msra.mxu1 %v3288_v63 }
 0xa66   : > { %3107 = vmatprep.subr.bf16.mxu1 %v3402_v1 }
 0xa68   : > { %3096 = vmatmul.mubr.msk.bf16.vlgmr.msra.gmra.mrb[48].mxu1 %vm221_vm1, %v3514_v5 }
 0xa69   : > { %3111 = vmatprep.mubr.msk.bf16.mxu1 %vm3403_vm0, %v3402_v1  ;;  %3108 = vmatpush3.bf16.msra.mxu1 %v3289_v14 }
 0xa6a   : > { %3109 = vmatprep.subr.bf16.mxu1 %v3402_v1 }
 0xa6d   : > { %3110 = vmatpush3.bf16.msra.mxu1 %v3290_v15  ;;  %v705_v15 = vsel %vm418_vm3, %v3610_v10, 0.0  ;;  %v3299_v10 = vld [vmem:[%s3987_s1 + $0x70] sm:$0xff]  }
 0xa6e   : > { %3121 = vmatprep.subr.bf16.mxu1 %v3402_v1 }
 0xa70   : > { %3112 = vmatmul.mubr.msk.bf16.vlgmr.msra.gmra.mrb[52].mxu1 %vm221_vm1, %v3514_v5 }
 0xa71   : > { %3123 = vmatprep.mubr.msk.bf16.mxu1 %vm3403_vm0, %v3402_v1 }
 0xb33   : > { %v1545_v50 = vpop.f32.mrb[44].mxu1 }
 0xb34   : > { %v3083_v51 = vpop.f32.mrb[45].mxu1  ;;  %v1551_v52 = vsel %vm418_vm3, %v1545_v50, -inf }
 0xb35   : > { %1552 = vmax.xlane.f32.xlu0 %v1551_v52  ;;  %v1548_v53 = vpop.f32.mrb[46].mxu1  ;;  %v3292_v52 = vld [vmem:[%s3987_s1 + $0xe8] sm:$0xff]  }
 0xb36   : > { %v3084_v54 = vpop.f32.mrb[47].mxu1 }
 0xb3b   : > { %v1677_v9 = vpop.f32.mrb[48].mxu1 }
 0xb3c   : > { %v3097_v11 = vpop.f32.mrb[49].mxu1  ;;  %v1787_v28 = vpack.c.bf16 %v1677_v9, %v1677_v9 }
 0xb3d   : > { %v1680_v12 = vpop.f32.mrb[50].mxu1 }
 0xb3e   : > { %v3098_v13 = vpop.f32.mrb[51].mxu1 }
 0xb43   : > { %v1781_v34 = vpop.f32.mrb[52].mxu1 }
 0xb44   : > { %v1845_v36 = vpack.c.bf16 %v1781_v34, %v1781_v34  ;;  %v3113_v38 = vpop.f32.mrb[53].mxu1  ;;  %v3298_v34 = vld [vmem:[%s3987_s1 + $0xf8] sm:$0xff]  }
 0xb45   : > { %v1784_v39 = vpop.f32.mrb[54].mxu1 }
 0xb46   : > { %v1850_v40 = vsel %vm433_vm4, %v1845_v36, 0  ;;  %v3114_v41 = vpop.f32.mrb[55].mxu1 }
 0xb47   : > { %3122 = vmatpush3.bf16.msra.mxu1 %v1850_v40  ;;  %v3301_v41 = vld [vmem:[%s3987_s1 + $0x170] sm:$0xff]  }
 0xb48   : > { %3135 = vmatprep.subr.bf16.mxu1 %v3402_v1 }
 0xbc2   : > { %v1553_v0 = vpop.xlane.xlu0 %1552 }
 0xbc3   : > { %v1554_v2 = vsub.f32 %v1545_v50, %v1553_v0  ;;  %v3291_v50 = vld [vmem:[%s3987_s1 + $0xe0] sm:$0xff]  }
 0xbc5   : > { %v1555_v3 = vmul.f32 1.442695, %v1554_v2 }
 0xbc7   : > { %3313 = vpow2.f32 %v1555_v3 }
 0xbd1   : > { %v3769_v4 = vpop.eup %3313 }
 0xbd2   : > { %v1560_v7 = vpack.c.bf16 %v3769_v4, %v3769_v4 }
 0xbd4   : > { %3088 = vmatmul.mubr.msk.bf16.vlgmr.msra.gmra.mrb[48].mxu0 %vm418_vm3, %v1560_v7 }
 0xbd5   : > { %3100 = vmatpush3.bf16.msra.mxu0 %v3285_v6  ;;  %3103 = vmatprep.mubr.msk.bf16.mxu0 %vm3403_vm0, %v3402_v1 }
 0xbd6   : > { %3101 = vmatprep.subr.bf16.mxu0 %v3402_v1 }
 0xbd9   : > { %3102 = vmatpush3.bf16.msra.mxu0 %v3286_v8 }
 0xbda   : > { %3115 = vmatprep.subr.bf16.mxu0 %v3402_v1 }
 0xbdc   : > { %3104 = vmatmul.mubr.msk.bf16.vlgmr.msra.gmra.mrb[52].mxu0 %vm221_vm1, %v3514_v5 }
 0xbdd   : > { %3117 = vmatprep.mubr.msk.bf16.mxu0 %vm3403_vm0, %v3402_v1 }
 0xca7   : > { %v3800_v16 = vpop.f32.mrb[48].mxu0 }
 0xca8   : > { %v3089_v17 = vpop.f32.mrb[49].mxu0 }
 0xca9   : > { %v1605_v18 = vpop.f32.mrb[50].mxu0  ;;  %v1273_v17 = vsel %vm418_vm3, %v3716_v26, 0.0  ;;  %v3300_v26 = vld [vmem:[%s3987_s1 + $0x78] sm:$0xff]  }
 0xcaa   : > { %v3090_v19 = vpop.f32.mrb[51].mxu0 }
 0xcaf   : > { %v1729_v21 = vpop.f32.mrb[52].mxu0 }
 0xcb0   : > { %v1788_v22 = vpack.c.bf16 %v1729_v21, %v1729_v21  ;;  %v3105_v23 = vpop.f32.mrb[53].mxu0 }
 0xcb1   : > { %v1732_v24 = vpop.f32.mrb[54].mxu0 }
 0xcb2   : > { %v1793_v25 = vsel %vm371_vm2, %v1788_v22, 0  ;;  %v3106_v27 = vpop.f32.mrb[55].mxu0 }
 0xcb3   : > { %3116 = vmatpush3.bf16.xpose.msra.mxu0 %v1793_v25  ;;  %v3337_v27 = vld [vmem:[%s3510_s13] sm:$0xf]  ;;  %s2614_s13 = sshll.u32 %s186_s22, 3 }
 0xcb4   : > { %3127 = vmatprep.subr.bf16.mxu0 %v3402_v1  ;;  %s188_s29 = scalar_lea.vmem [#allocation3], %s2614_s13 }
 0xcba   : > { %3118 = vmatmul.mubr.msk.bf16.vlgmr.msra.gmra.mrb[56].mxu0 %vm371_vm2, %v1787_v28 }
 0xcbb   : > { %3131 = vmatprep.mubr.msk.bf16.mxu0 %vm3403_vm0, %v3402_v1  ;;  %3128 = vmatpush3.bf16.msra.mxu0 %v3293_v42  ;;  %v3302_v42 = vld [vmem:[%s3987_s1 + $0x178] sm:$0xff]  }
 0xcbc   : > { %3129 = vmatprep.subr.bf16.mxu0 %v3402_v1 }
 0xcbf   : > { %3130 = vmatpush3.bf16.msra.mxu0 %v3294_v43 }
 0xcc0   : > { %3143 = vmatprep.subr.bf16.mxu0 %v3402_v1 }
 0xcc2   : > { %3132 = vmatmul.mubr.msk.bf16.vlgmr.msra.gmra.mrb[60].mxu0 %vm221_vm1, %v3514_v5 }
 0xcc3   : > { %3147 = vmatprep.mubr.msk.bf16.mxu0 %vm3403_vm0, %v3402_v1  ;;  %3144 = vmatpush3.bf16.msra.mxu0 %v3295_v57 }
 0xcc4   : > { %3145 = vmatprep.subr.bf16.mxu0 %v3402_v1 }
 0xcc7   : > { %3146 = vmatpush3.bf16.msra.mxu0 %v3296_v58 }
 0xcc8   : > { %3157 = vmatprep.subr.bf16.mxu0 %v3402_v1 }
 0xcca   : > { %3148 = vmatmul.mubr.msk.bf16.vlgmr.msra.gmra.mrb[64].mxu0 %vm221_vm1, %v3514_v5 }
 0xccb   : > { %3159 = vmatprep.mubr.msk.bf16.mxu0 %vm3403_vm0, %v3402_v1 }
 0xd8d   : > { %v1829_v29 = vpop.f32.mrb[56].mxu0 }
 0xd8e   : > { %v3119_v30 = vpop.f32.mrb[57].mxu0  ;;  %v1835_v31 = vsel %vm418_vm3, %v1829_v29, -inf }
 0xd8f   : > { %1836 = vmax.xlane.f32.xlu1 %v1835_v31  ;;  %v1832_v32 = vpop.f32.mrb[58].mxu0 }
 0xd90   : > { %v3120_v33 = vpop.f32.mrb[59].mxu0  ;;  %v3297_v32 = vld [vmem:[%s3987_s1 + $0xf0] sm:$0xff]  }
 0xd95   : > { %v1961_v53 = vpop.f32.mrb[60].mxu0 }
 0xd96   : > { %v3133_v54 = vpop.f32.mrb[61].mxu0  ;;  %v2071_v9 = vpack.c.bf16 %v1961_v53, %v1961_v53 }
 0xd97   : > { %v1964_v55 = vpop.f32.mrb[62].mxu0 }
 0xd98   : > { %v3134_v56 = vpop.f32.mrb[63].mxu0 }
 0xd9d   : > { %v2065_v19 = vpop.f32.mrb[64].mxu0 }
 0xd9e   : > { %v2129_v21 = vpack.c.bf16 %v2065_v19, %v2065_v19  ;;  %v3149_v22 = vpop.f32.mrb[65].mxu0 }
 0xd9f   : > { %v2068_v23 = vpop.f32.mrb[66].mxu0 }
 0xda0   : > { %v2134_v24 = vsel %vm433_vm4, %v2129_v21, 0  ;;  %v3150_v25 = vpop.f32.mrb[67].mxu0 }
 0xda1   : > { %3158 = vmatpush3.bf16.msra.mxu0 %v2134_v24 }
 0xda2   : > { %3171 = vmatprep.subr.bf16.mxu0 %v3402_v1 }
 0xe1c   : > { %v1837_v44 = vpop.xlane.xlu1 %1836 }
 0xe1d   : > { %v1838_v46 = vsub.f32 %v1829_v29, %v1837_v44 }
 0xe1f   : > { %v1839_v47 = vmul.f32 1.442695, %v1838_v46 }
 0xe21   : > { %3315 = vpow2.f32 %v1839_v47 }
 0xe2b   : > { %v3316_v48 = vpop.eup %3315 }
 0xe2c   : > { %v1844_v51 = vpack.c.bf16 %v3316_v48, %v3316_v48  ;;  %v1841_v18 = vsel %vm418_vm3, %v3316_v48, 0.0 }
 0xe2e   : > { %3124 = vmatmul.mubr.msk.bf16.vlgmr.msra.gmra.mrb[56].mxu1 %vm418_vm3, %v1844_v51 }
 0xe2f   : > { %3136 = vmatpush3.bf16.msra.mxu1 %v3291_v50  ;;  %3139 = vmatprep.mubr.msk.bf16.mxu1 %vm3403_vm0, %v3402_v1 }
 0xe30   : > { %3137 = vmatprep.subr.bf16.mxu1 %v3402_v1 }
 0xe33   : > { %3138 = vmatpush3.bf16.msra.mxu1 %v3292_v52 }
 0xe34   : > { %3151 = vmatprep.subr.bf16.mxu1 %v3402_v1 }
 0xe36   : > { %3140 = vmatmul.mubr.msk.bf16.vlgmr.msra.gmra.mrb[60].mxu1 %vm221_vm1, %v3514_v5 }
 0xe37   : > { %3153 = vmatprep.mubr.msk.bf16.mxu1 %vm3403_vm0, %v3402_v1 }
 0xf01   : > { %v3849_v60 = vpop.f32.mrb[56].mxu1 }
 0xf02   : > { %v3125_v61 = vpop.f32.mrb[57].mxu1 }
 0xf03   : > { %v1889_v62 = vpop.f32.mrb[58].mxu1 }
 0xf04   : > { %v3126_v63 = vpop.f32.mrb[59].mxu1 }
 0xf05   : > { %v989_v63 = vsel %vm418_vm3, %v3663_v49, 0.0 }
 0xf09   : > { %v2013_v0 = vpop.f32.mrb[60].mxu1 }
 0xf0a   : > { %v2072_v2 = vpack.c.bf16 %v2013_v0, %v2013_v0  ;;  %v3141_v3 = vpop.f32.mrb[61].mxu1  ;;  %v1557_v0 = vsel %vm418_vm3, %v3769_v4, 0.0 }
 0xf0b   : > { %v2016_v6 = vpop.f32.mrb[62].mxu1  ;;  %v425_v3 = vsel %vm418_vm3, %v3557_v35, 0.0 }
 0xf0c   : > { %v2077_v7 = vsel %vm371_vm2, %v2072_v2, 0  ;;  %v3142_v8 = vpop.f32.mrb[63].mxu1 }
 0xf0d   : > { %3152 = vmatpush3.bf16.xpose.msra.mxu1 %v2077_v7 }
 0xf0e   : > { %3163 = vmatprep.subr.bf16.mxu1 %v3402_v1 }
 0xf14   : > { %3154 = vmatmul.mubr.msk.bf16.vlgmr.msra.gmra.mrb[64].mxu1 %vm371_vm2, %v2071_v9 }
 0xf15   : > { %3167 = vmatprep.mubr.msk.bf16.mxu1 %vm3403_vm0, %v3402_v1  ;;  %3164 = vmatpush3.bf16.msra.mxu1 %v3299_v10 }
 0xf16   : > { %3165 = vmatprep.subr.bf16.mxu1 %v3402_v1 }
 0xf19   : > { %3166 = vmatpush3.bf16.msra.mxu1 %v3300_v26 }
 0xf1a   : > { %3179 = vmatprep.subr.bf16.mxu1 %v3402_v1 }
 0xf1c   : > { %3168 = vmatmul.mubr.msk.bf16.vlgmr.msra.gmra.mrb[68].mxu1 %vm221_vm1, %v3337_v27 }
 0xf1d   : > { %3183 = vmatprep.mubr.msk.bf16.mxu1 %vm3403_vm0, %v3402_v1  ;;  %3180 = vmatpush3.bf16.msra.mxu1 %v3301_v41  ;;  %v3304_v41 = vld [vmem:[%s3988_s2 + $0x8] sm:$0xff]  }
 0xf1e   : > { %3181 = vmatprep.subr.bf16.mxu1 %v3402_v1 }
 0xf21   : > { %3182 = vmatpush3.bf16.msra.mxu1 %v3302_v42 }
 0xf22   : > { %3193 = vmatprep.subr.bf16.mxu1 %v3402_v1 }
 0xf24   : > { %3184 = vmatmul.mubr.msk.bf16.vlgmr.msra.gmra.mrb[72].mxu1 %vm221_vm1, %v3337_v27 }
 0xf25   : > { %3195 = vmatprep.mubr.msk.bf16.mxu1 %vm3403_vm0, %v3402_v1 }
 0xfe7   : > { %v2113_v5 = vpop.f32.mrb[64].mxu1 }
 0xfe8   : > { %v3155_v11 = vpop.f32.mrb[65].mxu1  ;;  %v2119_v12 = vsel %vm418_vm3, %v2113_v5, -inf }
 0xfe9   : > { %2120 = vmax.xlane.f32.xlu0 %v2119_v12  ;;  %v2116_v13 = vpop.f32.mrb[66].mxu1 }
 0xfea   : > { %v3156_v14 = vpop.f32.mrb[67].mxu1 }
 0xfed   : > { %706 = vadd.xlane.f32.xlu0 %v705_v15 }
 0xfef   : > { %v2245_v36 = vpop.f32.mrb[68].mxu1 }
 0xff0   : > { %v3169_v38 = vpop.f32.mrb[69].mxu1  ;;  %v2355_v55 = vpack.c.bf16 %v2245_v36, %v2245_v36 }
 0xff1   : > { %1274 = vadd.xlane.f32.xlu0 %v1273_v17  ;;  %v2248_v39 = vpop.f32.mrb[70].mxu1 }
 0xff2   : > { %v3170_v40 = vpop.f32.mrb[71].mxu1 }
 0xff5   : > { %1842 = vadd.xlane.f32.xlu0 %v1841_v18 }
 0xff7   : > { %v2349_v6 = vpop.f32.mrb[72].mxu1 }
 0xff8   : > { %v2413_v7 = vpack.c.bf16 %v2349_v6, %v2349_v6  ;;  %v3185_v8 = vpop.f32.mrb[73].mxu1 }
 0xff9   : > { %v2352_v9 = vpop.f32.mrb[74].mxu1 }
 0xffa   : > { %v3186_v11 = vpop.f32.mrb[75].mxu1 }
0x1076   : > { %v2121_v28 = vpop.xlane.xlu0 %2120 }
0x1077   : > { %v2122_v29 = vsub.f32 %v2113_v5, %v2121_v28  ;;  %v2418_v5 = vsel %vm433_vm4, %v2413_v7, 0 }
0x1078   : > { %3194 = vmatpush3.bf16.msra.mxu1 %v2418_v5 }
0x1079   : > { %v2123_v30 = vmul.f32 1.442695, %v2122_v29 }
0x107a   : > { %v707_v49 = vpop.xlane.xlu0 %706 }
0x107b   : > { %3317 = vpow2.f32 %v2123_v30 }
0x107e   : > { %v1275_v15 = vpop.xlane.xlu0 %1274 }
0x1085   : > { %v3318_v31 = vpop.eup %3317 }
0x1086   : > { %v2128_v33 = vpack.c.bf16 %v3318_v31, %v3318_v31  ;;  %v2125_v2 = vsel %vm418_vm3, %v3318_v31, 0.0 }
0x1088   : > { %3160 = vmatmul.mubr.msk.bf16.vlgmr.msra.gmra.mrb[68].mxu0 %vm418_vm3, %v2128_v33 }
0x1089   : > { %3172 = vmatpush3.bf16.msra.mxu0 %v3297_v32  ;;  %3175 = vmatprep.mubr.msk.bf16.mxu0 %vm3403_vm0, %v3402_v1 }
0x108a   : > { %3173 = vmatprep.subr.bf16.mxu0 %v3402_v1 }
0x108d   : > { %3174 = vmatpush3.bf16.msra.mxu0 %v3298_v34 }
0x108e   : > { %3187 = vmatprep.subr.bf16.mxu0 %v3402_v1 }
0x1090   : > { %3176 = vmatmul.mubr.msk.bf16.vlgmr.msra.gmra.mrb[72].mxu0 %vm221_vm1, %v3337_v27  ;;  %v1843_v27 = vpop.xlane.xlu0 %1842 }
0x1091   : > { %3189 = vmatprep.mubr.msk.bf16.mxu0 %vm3403_vm0, %v3402_v1 }
0x115b   : > { %v3901_v43 = vpop.f32.mrb[68].mxu0 }
0x115c   : > { %v3161_v44 = vpop.f32.mrb[69].mxu0 }
0x115d   : > { %v2173_v46 = vpop.f32.mrb[70].mxu0 }
0x115e   : > { %v3162_v47 = vpop.f32.mrb[71].mxu0 }
0x1163   : > { %v2297_v48 = vpop.f32.mrb[72].mxu0 }
0x1164   : > { %v2356_v50 = vpack.c.bf16 %v2297_v48, %v2297_v48  ;;  %v3177_v51 = vpop.f32.mrb[73].mxu0 }
0x1165   : > { %v2300_v52 = vpop.f32.mrb[74].mxu0 }
0x1166   : > { %v2361_v53 = vsel %vm371_vm2, %v2356_v50, 0  ;;  %v3178_v54 = vpop.f32.mrb[75].mxu0 }
0x1167   : > { %3188 = vmatpush3.bf16.xpose.msra.mxu0 %v2361_v53 }
0x1168   : > { %3199 = vmatprep.subr.bf16.mxu0 %v3402_v1 }
0x116e   : > { %3190 = vmatmul.mubr.msk.bf16.vlgmr.msra.gmra.mrb[76].mxu0 %vm371_vm2, %v2355_v55 }
0x116f   : > { %3203 = vmatprep.mubr.msk.bf16.mxu0 %vm3403_vm0, %v3402_v1 }
0x1241   : > { %v2397_v56 = vpop.f32.mrb[76].mxu0 }
0x1242   : > { %v3191_v57 = vpop.f32.mrb[77].mxu0  ;;  %v2403_v58 = vsel %vm418_vm3, %v2397_v56, -inf }
0x1243   : > { %2404 = vmax.xlane.f32.xlu1 %v2403_v58  ;;  %v2400_v61 = vpop.f32.mrb[78].mxu0 }
0x1244   : > { %v3192_v62 = vpop.f32.mrb[79].mxu0 }
0x1247   : > { %990 = vadd.xlane.f32.xlu1 %v989_v63 }
0x124b   : > { %1558 = vadd.xlane.f32.xlu1 %v1557_v0 }
0x124f   : > { %2126 = vadd.xlane.f32.xlu1 %v2125_v2 }
0x1253   : > { %426 = vadd.xlane.f32.xlu1 %v425_v3 }
0x12d0   : > { %v2405_v12 = vpop.xlane.xlu1 %2404 }
0x12d1   : > { %v2406_v13 = vsub.f32 %v2397_v56, %v2405_v12 }
0x12d3   : > { %v2407_v4 = vmul.f32 1.442695, %v2406_v13 }
0x12d4   : > { %v991_v14 = vpop.xlane.xlu1 %990 }
0x12d5   : > { %3319 = vpow2.f32 %v2407_v4 }
0x12d6   : > { %3321 = vrcp.f32 %v991_v14 }
0x12d7   : > { %3323 = vrcp.f32 %v1275_v15 }
0x12d8   : > { %v1559_v17 = vpop.xlane.xlu1 %1558 }
0x12d9   : > { %3325 = vrcp.f32 %v1559_v17 }
0x12dc   : > { %v2127_v35 = vpop.xlane.xlu1 %2126 }
0x12dd   : > { %3327 = vrcp.f32 %v2127_v35 }
0x12df   : > { %v3320_v18 = vpop.eup %3319 }
0x12e0   : > { %v3322_v19 = vpop.eup %3321  ;;  %v427_v21 = vpop.xlane.xlu1 %426  ;;  %v2409_v22 = vsel %vm418_vm3, %v3320_v18, 0.0  ;;  %v2412_v23 = vpack.c.bf16 %v3320_v18, %v3320_v18 }
0x12e1   : > { %3329 = vrcp.f32 %v427_v21  ;;  %2410 = vadd.xlane.f32.xlu0 %v2409_v22  ;;  %v1041_v24 = vmul.f32 %v3322_v19, %v3694_v59  ;;  %v3324_v25 = vpop.eup %3323 }
0x12e2   : > { %3196 = vmatmul.mubr.msk.bf16.vlgmr.msra.gmra.mrb[76].mxu1 %vm418_vm3, %v2412_v23  ;;  %v1325_v10 = vmul.f32 %v3324_v25, %v3747_v37  ;;  %3331 = vrcp.f32 %v707_v49 }
0x12e3   : > { %1043 = vrot.lane.b32.xlu1 %v1041_v24, %s3404_s30  ;;  %v3326_v26 = vpop.eup %3325  ;;  %3333 = vrcp.f32 %v1843_v27  ;;  %s2551_s30 = sshll.u32 %s188_s29, 4  ;;  %s3945_s30 = int_to_ptr.vmem [resolvable:$true] %s2551_s30 }
0x12e4   : > { %v1609_v28 = vmul.f32 %v3326_v26, %v3800_v16 }
0x12e7   : > { %1327 = vrot.lane.b32.xlu1 %v1325_v10, %s3405_s5  ;;  %v3328_v29 = vpop.eup %3327 }
0x12e8   : > { %v2177_v31 = vmul.f32 %v3328_v29, %v3901_v43 }
0x12eb   : > { %v3330_v30 = vpop.eup %3329  ;;  %1611 = vrot.lane.b32.xlu1 %v1609_v28, %s3406_s6 }
0x12ec   : > { %v478_v59 = vmul.f32 %v3330_v30, %v3588_v45  ;;  %v3332_v37 = vpop.eup %3331 }
0x12ed   : > { %v757_v32 = vmul.f32 %v3332_v37, %v3641_v20  ;;  %v3334_v33 = vpop.eup %3333 }
0x12ee   : > { %479 = vst.msk [vmem:[#allocation2] sm:$0xff] %vm371_vm2, %v478_v59  ;;  %v1893_v16 = vmul.f32 %v3334_v33, %v3849_v60  ;;  %v3303_v60 = vld [vmem:[%s3988_s2] sm:$0xff]  }
0x12ef   : > { %2179 = vrot.lane.b32.xlu1 %v2177_v31, %s3407_s7  ;;  %3200 = vmatpush3.bf16.msra.mxu0 %v3303_v60  ;;  %s3943_s7 = scalar_lea.hbm %s3990_s4, %s2801_s28 }
0x12f0   : > { %3201 = vmatprep.subr.bf16.mxu0 %v3402_v1  ;;  %v2796_v1 = vld [vmem:[%s3989_s3] ss:$0 sm:$0xff] }
0x12f3   : > { %3202 = vmatpush3.bf16.msra.mxu0 %v3304_v41 }
0x12f7   : > { %759 = vrot.lane.b32.xlu0 %v757_v32, %s3408_s8  ;;  %s3338_s8 = scalar_lea.vmem %s3945_s30, 128 }
0x12f8   : > { %p3339_p11 = scmp.ne.s32.totalorder %s3945_s30, %s3338_s8 }
0x12fa   : > { %p3340_p12 = pnand %p3339_p11, %p3475_p5 }
0x12fb   : > { %1895 = vrot.lane.b32.xlu0 %v1893_v16, %s3409_s9  ;;  %s3411_s9 = smov [#allocation3]  }
0x12fc   : > { %p3341_p13 = pneg %p3340_p12  ;;  %s3342_s10 = sshll.u32 %s3411_s9, 4  ;;  %s3343_s10 = int_to_ptr.vmem [resolvable:$false] %s3342_s10 }
0x12fd   : > { %s3344_s11 = scalar_lea.vmem %s3343_s10, 256  ;;  %p3345_p0 = scmp.lt.s32.totalorder %s3945_s30, %s3343_s10 }
0x12fe   : > { %p3346_p1 = scmp.lt.s32.totalorder %s3344_s11, %s3338_s8 }
0x1300   : > { %p3347_p2 = por %p3346_p1, %p3345_p0 }
0x1302   : > { %p3348_p3 = pnand %p3347_p2, %p3341_p13 }
0x1355   : > { %v1044_v34 = vpop.permute.xlu1 %1043 }
0x1359   : > { %v1328_v36 = vpop.permute.xlu1 %1327 }
0x135d   : > { %v1612_v45 = vpop.permute.xlu1 %1611 }
0x1361   : > { %v2180_v40 = vpop.permute.xlu1 %2179 }
0x136e   : > { %v2411_v38 = vpop.xlane.xlu0 %2410 }
0x136f   : > { %3335 = vrcp.f32 %v2411_v38 }
0x1372   : > { %v760_v39 = vpop.permute.xlu0 %759 }
0x1373   : > { %763 = vst.msk [vmem:[#allocation2] sm:$0xff] %vm762_vm5, %v760_v39 }
0x1374   : > { %1047 = vst.msk [vmem:[#allocation2] sm:$0xff] %vm1046_vm6, %v1044_v34 }
0x1375   : > { %1331 = vst.msk [vmem:[#allocation2] sm:$0xff] %vm1330_vm7, %v1328_v36 }
0x1376   : > { %v1896_v20 = vpop.permute.xlu0 %1895  ;;  %1615 = vst.msk [vmem:[#allocation2] sm:$0xff] %vm1614_vm8, %v1612_v45 }
0x1377   : > { %1899 = vst.msk [vmem:[#allocation2] sm:$0xff] %vm1898_vm9, %v1896_v20 }
0x1378   : > { %2183 = vst.msk [vmem:[#allocation2] sm:$0xff] %vm2182_vm10, %v2180_v40 }
0x1379   : > { %v3336_v42 = vpop.eup %3335 }
0x13b5   : > { %v2454_v43 = vpop.f32.mrb[76].mxu1 }
0x13b6   : > { %v2461_v44 = vmul.f32 %v3336_v42, %v2454_v43  ;;  %v3197_v46 = vpop.f32.mrb[77].mxu1 }
0x13b7   : > { %v2457_v47 = vpop.f32.mrb[78].mxu1 }
0x13b8   : > { %v3198_v48 = vpop.f32.mrb[79].mxu1  ;;  %2463 = vrot.lane.b32.xlu0 %v2461_v44, %s3410_s20 }
0x142a   : > { %v2464_v50 = vpop.permute.xlu0 %2463 }
0x142b   : > { %2467 = vst.msk [vmem:[#allocation2] sm:$0xff] %vm2466_vm11, %v2464_v50 }
0x1432   : > { %v2468_v51 = vld [vmem:[#allocation2] sm:$0xff] }
0x1433   : > { %v2469_v52 = vpack.c.bf16 %v2468_v51, %v2468_v51 }
0x1435   : > { %3204 = vmatmul.mubr.msk.bf16.vlgmr.msra.gmra.mrb[80].mxu0 %vm221_vm1, %v2469_v52 }
0x1508   : > { %v2530_v53 = vpop.f32.mrb[80].mxu0 }
0x1509   : > { %v2531_v54 = vadd.f32 %v2796_v1, %v2530_v53  ;;  %v3205_v55 = vpop.f32.mrb[81].mxu0 }
0x150a   : > { %v2533_v56 = vpop.f32.mrb[82].mxu0 }
0x150b   : > { %v3206_v57 = vpop.f32.mrb[83].mxu0  ;;  %2536 = vst.msk [vmem:[%s188_s29] sm:$0xff] %vm221_vm1, %v2531_v54 }
0x150c   : > { %3351 = shalt.err (!%p3348_p3)
}
0x150d   : > { %s3352_s12 = scalar_lea.hbm %s3943_s7, 128  ;;  %s3356_s22 = scalar_lea.hbm %s3990_s4, 256 }
0x150e   : > { %p3353_p4 = scmp.ne.s32.totalorder %s3943_s7, %s3352_s12  ;;  %p3357_p9 = scmp.lt.u32.totalorder %s3943_s7, %s3990_s4 }
0x150f   : > { %p3358_p10 = scmp.lt.u32.totalorder %s3356_s22, %s3352_s12  ;;  %p3360_p12 = scmp.lt.u32.totalorder %s3352_s12, %s3943_s7 }
0x1510   : > { %p3354_p7 = pnand %p3353_p4, %p3475_p5 }
0x1511   : > { %p3359_p11 = por %p3358_p10, %p3357_p9 }
0x1512   : > { %p3355_p8 = pneg %p3354_p7 }
0x1513   : > { %p3361_p13 = por %p3360_p12, %p3359_p11 }
0x1515   : > { %p3362_p0 = pnand %p3361_p13, %p3355_p8 }
0x1517   : > { %3365 = shalt.err (!%p3362_p0)
}
0x1518   : > { %3207 = dma.vmem_to_hbm [thread:$0]  (%p3475_p5), %s3945_s30, 128, %s3943_s7, %s2538_s19  }
0x1519 PF: > { %p3213_p1 = scmp.ge.s32.totalorder %s3400_s18, 2  ;;  %s2563_s27 = sand.u32 1, %s3388_s15  }
0x151a   : > { %s2564_s28 = scalar_lea.sflag [#allocation4], %s2563_s27 }
0x151b   : > { %p3210_p2 = pnand %p3213_p1, %p3479_p6 }
0x151d   : > { %3383 = dma.done.wait (!%p3210_p2), %s2564_s28, 128  }
0x151e   : > { %3385 = vsyncadd (!%p3210_p2), %s2564_s28, 4294967168  ;;  %p14_p3 = scmp.ge.s32.totalorder %s3462_s21, 4   ;;  %s3993_s15 = smov %s3392_s16 }
0x151f   : > { %s3994_s16 = smov %s3396_s17  ;;  %s3995_s17 = smov %s3473_s24 }
0x1520   : > { %s3996_s18 = smov %s3462_s21  ;;  %16 = sbr.rel (!%p14_p3) target bundleno = 3 (0x3), region = 94 }
0x1527   :  { %2569 = vsyncpa [#allocation4], 1 }
0x1528   :  { %2571 = vsyncpa [#allocation4 + $0x1], 1 }

</bundles_post_ra>
